<compile_context>
chip_gen: v7x
topology: tpu7x:2x2x1
jax: 0.10.0
libtpu: 0.0.40
codegen_flags: <defaults>
</compile_context>

<pallas_src>
import numpy as np
import jax
import jax.numpy as jnp
from jax import lax
from jax.experimental import pallas as pl
from jax.experimental.pallas import tpu as pltpu

EPS = 1e-5
MATMUL_DTYPE = jnp.float32   # see bf16 TODO above


# --------------------------------------------------------------------------------------
# in-kernel helpers (traced inside the Pallas kernel; C/H/W are static python ints)
# --------------------------------------------------------------------------------------
def _build_slab(src_ref, H, slab_ref):
    """Banded im2col: copy the 3 dy-strips of the H-padded plane into the slab.

    src_ref : (N, H+2, D) ref, D = 2*W*C lanes laid out [real w*C+c | imag w*C+c].
    slab_ref: (N*H, 3*D) scratch, dy-major column blocks.  3 contiguous, lane-aligned copies.
    """
    N, _, D = src_ref.shape
    for dy in range(3):
        strip = src_ref[:, dy:dy + H, :]                       # direct ref slice-load
        slab_ref[:, dy * D:(dy + 1) * D] = strip.reshape(N * H, D).astype(slab_ref.dtype)


def _bn_crelu(z, g, b, selT, C, W):
    """Complex BatchNorm (batch stats, Trabelsi whitening) + CReLU on the fused GEMM output.

    z   : (R, 2*W*C) — real-part columns [0:W*C), imag-part columns [W*C:2*W*C).
    g   : (4, C) rows [grr, gri, gir, gii];  b: (2, C) rows [br, bi].
    selT: (C, W*C) channel selector, selT[c, w*C+c'] = (c == c').
    Returns (out_r, out_i), each (R, W*C), CReLU applied.
    """
    R = z.shape[0]
    WC = W * C
    zr = z[:, 0:WC]                 # 128-lane aligned slices of the fused GEMM output
    zi = z[:, WC:2 * WC]
    inv_cnt = 1.0 / float(R * W)

    # one-pass statistics: 5 column sums, then ONE dot_general folds w -> per-channel
    sums = jnp.concatenate([
        jnp.sum(zr, axis=0, keepdims=True),
        jnp.sum(zi, axis=0, keepdims=True),
        jnp.sum(zr * zr, axis=0, keepdims=True),
        jnp.sum(zi * zi, axis=0, keepdims=True),
        jnp.sum(zr * zi, axis=0, keepdims=True)], axis=0)                  # (5, W*C)
    per = lax.dot_general(sums, selT, dimension_numbers=(((1,), (1,)), ((), ())),
                          preferred_element_type=jnp.float32) * inv_cnt    # (5, C)

    mr, mi = per[0:1], per[1:2]
    vrr = per[2:3] - mr * mr + EPS
    vii = per[3:4] - mi * mi + EPS
    vri = per[4:5] - mr * mi

    # inverse square root of the per-channel 2x2 covariance (Trabelsi whitening)
    s = jnp.sqrt(vrr * vii - vri * vri)
    t = jnp.sqrt(vrr + vii + 2.0 * s)
    inv = pl.reciprocal(s * t, approx=False)    # (1, C) vector; exact form keeps 1e-3 margin
    wrr = (vii + s) * inv
    wii = (vrr + s) * inv
    wri = -vri * inv

    # fold whitening + affine gamma/beta into one per-channel 2x2 affine, broadcast via MXU
    grr, gri, gir, gii = g[0:1], g[1:2], g[2:3], g[3:4]
    br, bi = b[0:1], b[1:2]
    arr = grr * wrr + gri * wri
    ari = grr * wri + gri * wii
    air = gir * wrr + gii * wri
    aii = gir * wri + gii * wii
    kr = br - arr * mr - ari * mi
    ki = bi - air * mr - aii * mi
    coef = jnp.concatenate([arr, ari, air, aii, kr, ki], axis=0)          # (6, C)
    ct = jnp.dot(coef, selT, preferred_element_type=jnp.float32)          # (6, W*C)

    out_r = jnp.maximum(ct[0:1] * zr + ct[1:2] * zi + ct[4:5], 0.0)       # CReLU
    out_i = jnp.maximum(ct[2:3] * zr + ct[3:4] * zi + ct[5:6], 0.0)
    return out_r, out_i


# --------------------------------------------------------------------------------------
# host-side weight packing (pure layout plumbing)
# --------------------------------------------------------------------------------------
def _pack_weights_banded(w, W):
    """(3,3,Cin,Cout) complex -> (3*2*W*Cin, 2*W*Cout) f32 banded GEMM weights.

    Row order : dy-major, then [real-plane | imag-plane], then w_in*Cin + cin
                (matches the slab layout built by _build_slab).
    Col order : [real-out | imag-out], then w_out*Cout + cout.
    The 3-tap w-direction structure AND the replicate W-padding are folded into the band:
    output column w reads input positions clip(w-1+dx, 0, W-1), dx in {0,1,2}, so edge
    columns duplicate the clamped contribution and no W padding is needed at runtime.
    """
    wr = jnp.real(w).astype(jnp.float32)
    wi = jnp.imag(w).astype(jnp.float32)
    Cin, Cout = int(w.shape[2]), int(w.shape[3])

    pos = np.clip(np.arange(W)[None, :] - 1 + np.arange(3)[:, None], 0, W - 1)        # (3, W)
    band_sel = jnp.asarray((np.arange(W)[:, None, None] == pos[None]).astype(np.float32))  # (W,3,W)

    def band(k):                                    # (3,3,Cin,Cout) -> (3, W*Cin, W*Cout)
        m = jnp.einsum('xdw,edio->exiwo', band_sel, k)   # (dy, w_in, Cin, w_out, Cout)
        return m.reshape(3, W * Cin, W * Cout)

    br_, bi_ = band(wr), band(wi)
    top = jnp.concatenate([br_, bi_], axis=2)       # real-plane rows: [-> real out | -> imag out]
    bot = jnp.concatenate([-bi_, br_], axis=2)      # imag-plane rows
    blocks = jnp.concatenate([top, bot], axis=1)    # (3, 2*W*Cin, 2*W*Cout)
    return blocks.reshape(6 * W * Cin, 2 * W * Cout).astype(MATMUL_DTYPE)


# --------------------------------------------------------------------------------------
# public wrapper
# --------------------------------------------------------------------------------------
def double_conv(x_nchw, w1, g1, b1, w2, g2, b2):
    """x_nchw: (N, Cin, H, W) complex64.  Returns (N, Cout, H, W) complex64."""
    N, Cin, H, W = (int(d) for d in x_nchw.shape)
    Cmid = int(w1.shape[-1])
    Cout = int(w2.shape[-1])

    # glue: NCHW -> NHWC, replicate-pad in H only (W padding lives in the banded weights),
    # split real/imag and merge into one [real | imag] lane-dense plane.
    x = jnp.transpose(x_nchw, (0, 2, 3, 1))
    xp = jnp.pad(x, ((0, 0), (1, 1), (0, 0), (0, 0)), mode='edge')          # (N, H+2, W, Cin)
    xr = jnp.real(xp).astype(MATMUL_DTYPE).reshape(N, H + 2, W * Cin)
    xi = jnp.imag(xp).astype(MATMUL_DTYPE).reshape(N, H + 2, W * Cin)
    xcat = jnp.concatenate([xr, xi], axis=-1)                               # (N, H+2, 2*W*Cin)

    w1p = _pack_weights_banded(w1, W)              # (6*W*Cin,  2*W*Cmid)  = (384, 256)
    w2p = _pack_weights_banded(w2, W)              # (6*W*Cmid, 2*W*Cout)  = (768, 256)
    selT1 = jnp.tile(jnp.eye(Cmid, dtype=jnp.float32), (1, W))   # (Cmid, W*Cmid)
    selT2 = jnp.tile(jnp.eye(Cout, dtype=jnp.float32), (1, W))   # (Cout, W*Cout)

    WCm, WCo = W * Cmid, W * Cout

    def kernel(x_ref, w1_ref, g1_ref, b1_ref, sel1_ref,
               w2_ref, g2_ref, b2_ref, sel2_ref,
               out_ref, slab1_ref, slab2_ref, hpad_ref):
        # ---------------- block 1: conv -> complex BN -> CReLU ----------------
        _build_slab(x_ref, H, slab1_ref)
        z1 = jnp.dot(slab1_ref[...], w1_ref[...],
                     preferred_element_type=jnp.float32)                    # (N*H, 2*W*Cmid)
        h1r, h1i = _bn_crelu(z1, g1_ref[...], b1_ref[...], sel1_ref[...], Cmid, W)

        # replicate H-padding of the mid activation (W padding is folded into the weights);
        # all stores are full-lane-width at offsets 0 / 128.
        h3r = h1r.reshape(N, H, WCm)
        h3i = h1i.reshape(N, H, WCm)
        hpad_ref[:, 1:H + 1, 0:WCm] = h3r
        hpad_ref[:, 1:H + 1, WCm:2 * WCm] = h3i
        hpad_ref[:, 0:1, 0:WCm] = h3r[:, 0:1, :]
        hpad_ref[:, 0:1, WCm:2 * WCm] = h3i[:, 0:1, :]
        hpad_ref[:, H + 1:H + 2, 0:WCm] = h3r[:, H - 1:H, :]
        hpad_ref[:, H + 1:H + 2, WCm:2 * WCm] = h3i[:, H - 1:H, :]

        # ---------------- block 2: conv -> complex BN -> CReLU ----------------
        _build_slab(hpad_ref, H, slab2_ref)
        z2 = jnp.dot(slab2_ref[...], w2_ref[...],
                     preferred_element_type=jnp.float32)                    # (N*H, 2*W*Cout)
        o_r, o_i = _bn_crelu(z2, g2_ref[...], b2_ref[...], sel2_ref[...], Cout, W)

        # single lane-dense output slab, [real | imag] halves at the 128-lane boundary
        out_ref[:, 0:WCo] = o_r
        out_ref[:, WCo:2 * WCo] = o_i

    vmem = pl.BlockSpec(memory_space=pltpu.MemorySpace.VMEM)
    out = pl.pallas_call(
        kernel,
        out_shape=jax.ShapeDtypeStruct((N * H, 2 * WCo), jnp.float32),
        in_specs=[vmem] * 9,
        out_specs=vmem,
        scratch_shapes=[
            pltpu.VMEM((N * H, 6 * W * Cin), MATMUL_DTYPE),     # banded im2col slab, conv1
            pltpu.VMEM((N * H, 6 * W * Cmid), MATMUL_DTYPE),    # banded im2col slab, conv2
            pltpu.VMEM((N, H + 2, 2 * WCm), jnp.float32),       # H-padded mid activation
        ],
    )(xcat, w1p, g1, b1, selT1, w2p, g2, b2, selT2)

    yr = out[:, 0:WCo].reshape(N, H, W, Cout)
    yi = out[:, WCo:2 * WCo].reshape(N, H, W, Cout)
    y = (yr + 1j * yi).astype(jnp.complex64)
    return jnp.transpose(y, (0, 3, 1, 2))                                   # back to NCHW


# ----------------------- pure-JAX reference (for verification) -----------------------
def _ref_forward(x_nchw, w1, g1, b1, w2, g2, b2):
    x = jnp.transpose(x_nchw, (0, 2, 3, 1))

    def cconv(x, w):
        xp = jnp.pad(x, ((0, 0), (1, 1), (1, 1), (0, 0)), mode='edge')
        xr, xi = jnp.real(xp), jnp.imag(xp)
        wr, wi = jnp.real(w), jnp.imag(w)
        dn = ('NHWC', 'HWIO', 'NHWC')
        conv = lambda a, k: jax.lax.conv_general_dilated(a, k, (1, 1), 'VALID',
                                                         dimension_numbers=dn)
        return (conv(xr, wr) - conv(xi, wi)) + 1j * (conv(xr, wi) + conv(xi, wr))

    def cbn(y, g, b):
        yr, yi = jnp.real(y), jnp.imag(y)
        mr = yr.mean(axis=(0, 1, 2)); mi = yi.mean(axis=(0, 1, 2))
        cr = yr - mr; ci = yi - mi
        vrr = (cr * cr).mean(axis=(0, 1, 2)) + EPS
        vii = (ci * ci).mean(axis=(0, 1, 2)) + EPS
        vri = (cr * ci).mean(axis=(0, 1, 2))
        s = jnp.sqrt(vrr * vii - vri * vri)
        t = jnp.sqrt(vrr + vii + 2.0 * s)
        inv = 1.0 / (s * t)
        wrr = (vii + s) * inv; wii = (vrr + s) * inv; wri = -vri * inv
        xhr = wrr * cr + wri * ci
        xhi = wri * cr + wii * ci
        outr = g[0] * xhr + g[1] * xhi + b[0]
        outi = g[2] * xhr + g[3] * xhi + b[1]
        return outr + 1j * outi

    crelu = lambda z: jnp.maximum(jnp.real(z), 0.0) + 1j * jnp.maximum(jnp.imag(z), 0.0)

    h = crelu(cbn(cconv(x, w1), g1, b1))
    y = crelu(cbn(cconv(h, w2), g2, b2))
    return jnp.transpose(y, (0, 3, 1, 2))


if __name__ == "__main__":
    # Small shapes consistent with DoubleConv(in_channels=4, out_channels=8)
    N, Cin, H, W = 2, 4, 16, 16
    Cmid = Cout = 8

    key = jax.random.PRNGKey(0)
    k1, k2, k3, k4, kx1, kx2 = jax.random.split(key, 6)

    def make_cweight(kr, ki, cin, cout):
        scale = 1.0 / np.sqrt(2.0 * 9 * cin)
        wr = jax.random.normal(kr, (3, 3, cin, cout), jnp.float32) * scale
        wi = jax.random.normal(ki, (3, 3, cin, cout), jnp.float32) * scale
        return (wr + 1j * wi).astype(jnp.complex64)

    w1 = make_cweight(k1, k2, Cin, Cmid)
    w2 = make_cweight(k3, k4, Cmid, Cout)

    # complex BN params, fresh-module defaults: gamma = diag(1/sqrt(2)), beta = 0
    def bn_params(c):
        g = jnp.stack([jnp.full((c,), 1.0 / np.sqrt(2.0), jnp.float32),   # grr
                       jnp.zeros((c,), jnp.float32),                      # gri
                       jnp.zeros((c,), jnp.float32),                      # gir
                       jnp.full((c,), 1.0 / np.sqrt(2.0), jnp.float32)])  # gii
        b = jnp.zeros((2, c), jnp.float32)
        return g, b

    g1, b1 = bn_params(Cmid)
    g2, b2 = bn_params(Cout)

    x = (jax.random.normal(kx1, (N, Cin, H, W), jnp.float32)
         + 1j * jax.random.normal(kx2, (N, Cin, H, W), jnp.float32)).astype(jnp.complex64)

    y = double_conv(x, w1, g1, b1, w2, g2, b2)
    y = jax.block_until_ready(y)

    y_ref = jax.block_until_ready(_ref_forward(x, w1, g1, b1, w2, g2, b2))
    np.testing.assert_allclose(np.asarray(y), np.asarray(y_ref), rtol=1e-3, atol=1e-3)

    print("KERNEL_OK")
</pallas_src>

<mosaic_0001>
module attributes {stable_mosaic.version = 11 : i64} {
  func.func @kernel(%arg0: memref<2x18x128xf32, #tpu.memory_space<vmem>>, %arg1: memref<384x256xf32, #tpu.memory_space<vmem>>, %arg2: memref<4x8xf32, #tpu.memory_space<vmem>>, %arg3: memref<2x8xf32, #tpu.memory_space<vmem>>, %arg4: memref<8x128xf32, #tpu.memory_space<vmem>>, %arg5: memref<768x256xf32, #tpu.memory_space<vmem>>, %arg6: memref<4x8xf32, #tpu.memory_space<vmem>>, %arg7: memref<2x8xf32, #tpu.memory_space<vmem>>, %arg8: memref<8x128xf32, #tpu.memory_space<vmem>>, %arg9: memref<32x256xf32, #tpu.memory_space<vmem>>, %arg10: memref<32x384xf32, #tpu.memory_space<vmem>>, %arg11: memref<32x768xf32, #tpu.memory_space<vmem>>, %arg12: memref<2x18x256xf32, #tpu.memory_space<vmem>>) attributes {dimension_semantics = [], scalar_prefetch = 0 : i64, scratch_operands = 3 : i64, tpu.core_type = #tpu.core_type<tc>} {
    %c0 = arith.constant 0 : index
    %c0_0 = arith.constant 0 : index
    %c0_1 = arith.constant 0 : index
    %0 = vector.load %arg0[%c0, %c0_0, %c0_1] : memref<2x18x128xf32, #tpu.memory_space<vmem>>, vector<2x16x128xf32>
    %1 = vector.shape_cast %0 : vector<2x16x128xf32> to vector<32x128xf32>
    %c0_2 = arith.constant 0 : index
    %c0_3 = arith.constant 0 : index
    %2 = vector.load %arg10[%c0_2, %c0_3] : memref<32x384xf32, #tpu.memory_space<vmem>>, vector<32x128xf32>
    tpu.vector_store %arg10[%c0_2, %c0_3], %1 {strides = array<i32>} : memref<32x384xf32, #tpu.memory_space<vmem>>, vector<32x128xf32>,
    %c0_4 = arith.constant 0 : index
    %c1 = arith.constant 1 : index
    %c0_5 = arith.constant 0 : index
    %3 = vector.load %arg0[%c0_4, %c1, %c0_5] : memref<2x18x128xf32, #tpu.memory_space<vmem>>, vector<2x16x128xf32>
    %4 = vector.shape_cast %3 : vector<2x16x128xf32> to vector<32x128xf32>
    %c0_6 = arith.constant 0 : index
    %c128 = arith.constant 128 : index
    %5 = vector.load %arg10[%c0_6, %c128] : memref<32x384xf32, #tpu.memory_space<vmem>>, vector<32x128xf32>
    tpu.vector_store %arg10[%c0_6, %c128], %4 {strides = array<i32>} : memref<32x384xf32, #tpu.memory_space<vmem>>, vector<32x128xf32>,
    %c0_7 = arith.constant 0 : index
    %c2 = arith.constant 2 : index
    %c0_8 = arith.constant 0 : index
    %6 = vector.load %arg0[%c0_7, %c2, %c0_8] : memref<2x18x128xf32, #tpu.memory_space<vmem>>, vector<2x16x128xf32>
    %7 = vector.shape_cast %6 : vector<2x16x128xf32> to vector<32x128xf32>
    %c0_9 = arith.constant 0 : index
    %c256 = arith.constant 256 : index
    %8 = vector.load %arg10[%c0_9, %c256] : memref<32x384xf32, #tpu.memory_space<vmem>>, vector<32x128xf32>
    tpu.vector_store %arg10[%c0_9, %c256], %7 {strides = array<i32>} : memref<32x384xf32, #tpu.memory_space<vmem>>, vector<32x128xf32>,
    %c0_10 = arith.constant 0 : index
    %c0_11 = arith.constant 0 : index
    %9 = vector.load %arg10[%c0_10, %c0_11] : memref<32x384xf32, #tpu.memory_space<vmem>>, vector<32x384xf32>
    %c0_12 = arith.constant 0 : index
    %c0_13 = arith.constant 0 : index
    %10 = vector.load %arg1[%c0_12, %c0_13] : memref<384x256xf32, #tpu.memory_space<vmem>>, vector<384x256xf32>
    %cst = arith.constant dense<0.000000e+00> : vector<32x256xf32>
    %11 = tpu.matmul %9, %10, %cst {dimension_numbers = #tpu.dot_dimension_numbers<[1], [0], [0], [1], [0, 0, 1, 1], [], []>} : vector<32x384xf32>, vector<384x256xf32>, vector<32x256xf32> -> vector<32x256xf32>
    %c0_14 = arith.constant 0 : index
    %c0_15 = arith.constant 0 : index
    %12 = vector.load %arg2[%c0_14, %c0_15] : memref<4x8xf32, #tpu.memory_space<vmem>>, vector<4x8xf32>
    %c0_16 = arith.constant 0 : index
    %c0_17 = arith.constant 0 : index
    %13 = vector.load %arg3[%c0_16, %c0_17] : memref<2x8xf32, #tpu.memory_space<vmem>>, vector<2x8xf32>
    %c0_18 = arith.constant 0 : index
    %c0_19 = arith.constant 0 : index
    %14 = vector.load %arg4[%c0_18, %c0_19] : memref<8x128xf32, #tpu.memory_space<vmem>>, vector<8x128xf32>
    %15 = vector.extract_strided_slice %11 {offsets = [0, 0], sizes = [32, 128], strides = [1, 1]} : vector<32x256xf32> to vector<32x128xf32>
    %16 = vector.extract_strided_slice %11 {offsets = [0, 128], sizes = [32, 128], strides = [1, 1]} : vector<32x256xf32> to vector<32x128xf32>
    %cst_20 = arith.constant dense<0.000000e+00> : vector<128xf32>
    %17 = vector.multi_reduction <add>, %15, %cst_20 [0] : vector<32x128xf32> to vector<128xf32>
    %18 = vector.shape_cast %17 : vector<128xf32> to vector<1x128xf32>
    %cst_21 = arith.constant dense<0.000000e+00> : vector<128xf32>
    %19 = vector.multi_reduction <add>, %16, %cst_21 [0] : vector<32x128xf32> to vector<128xf32>
    %20 = vector.shape_cast %19 : vector<128xf32> to vector<1x128xf32>
    %21 = arith.mulf %15, %15 : vector<32x128xf32>
    %cst_22 = arith.constant dense<0.000000e+00> : vector<128xf32>
    %22 = vector.multi_reduction <add>, %21, %cst_22 [0] : vector<32x128xf32> to vector<128xf32>
    %23 = vector.shape_cast %22 : vector<128xf32> to vector<1x128xf32>
    %24 = arith.mulf %16, %16 : vector<32x128xf32>
    %cst_23 = arith.constant dense<0.000000e+00> : vector<128xf32>
    %25 = vector.multi_reduction <add>, %24, %cst_23 [0] : vector<32x128xf32> to vector<128xf32>
    %26 = vector.shape_cast %25 : vector<128xf32> to vector<1x128xf32>
    %27 = arith.mulf %15, %16 : vector<32x128xf32>
    %cst_24 = arith.constant dense<0.000000e+00> : vector<128xf32>
    %28 = vector.multi_reduction <add>, %27, %cst_24 [0] : vector<32x128xf32> to vector<128xf32>
    %29 = vector.shape_cast %28 : vector<128xf32> to vector<1x128xf32>
    %30 = tpu.concatenate %18, %20, %23, %26, %29 in 0 : vector<1x128xf32>, vector<1x128xf32>, vector<1x128xf32>, vector<1x128xf32>, vector<1x128xf32> -> vector<5x128xf32>
    %cst_25 = arith.constant dense<0.000000e+00> : vector<5x8xf32>
    %31 = tpu.matmul %30, %14, %cst_25 {dimension_numbers = #tpu.dot_dimension_numbers<[1], [1], [0], [0], [0, 0, 1, 0], [], []>} : vector<5x128xf32>, vector<8x128xf32>, vector<5x8xf32> -> vector<5x8xf32>
    %cst_26 = arith.constant 0.001953125 : f32
    %32 = vector.broadcast %cst_26 : f32 to vector<5x8xf32>
    %33 = arith.mulf %31, %32 : vector<5x8xf32>
    %34 = vector.extract_strided_slice %33 {offsets = [0, 0], sizes = [1, 8], strides = [1, 1]} : vector<5x8xf32> to vector<1x8xf32>
    %35 = vector.extract_strided_slice %33 {offsets = [1, 0], sizes = [1, 8], strides = [1, 1]} : vector<5x8xf32> to vector<1x8xf32>
    %36 = vector.extract_strided_slice %33 {offsets = [2, 0], sizes = [1, 8], strides = [1, 1]} : vector<5x8xf32> to vector<1x8xf32>
    %37 = arith.mulf %34, %34 : vector<1x8xf32>
    %38 = arith.subf %36, %37 : vector<1x8xf32>
    %cst_27 = arith.constant 9.99999974E-6 : f32
    %39 = vector.broadcast %cst_27 : f32 to vector<1x8xf32>
    %40 = arith.addf %38, %39 : vector<1x8xf32>
    %41 = vector.extract_strided_slice %33 {offsets = [3, 0], sizes = [1, 8], strides = [1, 1]} : vector<5x8xf32> to vector<1x8xf32>
    %42 = arith.mulf %35, %35 : vector<1x8xf32>
    %43 = arith.subf %41, %42 : vector<1x8xf32>
    %cst_28 = arith.constant 9.99999974E-6 : f32
    %44 = vector.broadcast %cst_28 : f32 to vector<1x8xf32>
    %45 = arith.addf %43, %44 : vector<1x8xf32>
    %46 = vector.extract_strided_slice %33 {offsets = [4, 0], sizes = [1, 8], strides = [1, 1]} : vector<5x8xf32> to vector<1x8xf32>
    %47 = arith.mulf %34, %35 : vector<1x8xf32>
    %48 = arith.subf %46, %47 : vector<1x8xf32>
    %49 = arith.mulf %40, %45 : vector<1x8xf32>
    %50 = arith.mulf %48, %48 : vector<1x8xf32>
    %51 = arith.subf %49, %50 : vector<1x8xf32>
    %52 = math.sqrt %51 : vector<1x8xf32>
    %53 = arith.addf %40, %45 : vector<1x8xf32>
    %cst_29 = arith.constant 2.000000e+00 : f32
    %54 = vector.broadcast %cst_29 : f32 to vector<1x8xf32>
    %55 = arith.mulf %54, %52 : vector<1x8xf32>
    %56 = arith.addf %53, %55 : vector<1x8xf32>
    %57 = math.sqrt %56 : vector<1x8xf32>
    %58 = arith.mulf %52, %57 : vector<1x8xf32>
    %59 = tpu.reciprocal %58 : vector<1x8xf32> -> vector<1x8xf32>
    %60 = arith.addf %45, %52 : vector<1x8xf32>
    %61 = arith.mulf %60, %59 : vector<1x8xf32>
    %62 = arith.addf %40, %52 : vector<1x8xf32>
    %63 = arith.mulf %62, %59 : vector<1x8xf32>
    %cst_30 = arith.constant 0.000000e+00 : f32
    %64 = vector.broadcast %cst_30 : f32 to vector<1x8xf32>
    %65 = arith.subf %64, %48 : vector<1x8xf32>
    %66 = arith.mulf %65, %59 : vector<1x8xf32>
    %67 = vector.extract_strided_slice %12 {offsets = [0, 0], sizes = [1, 8], strides = [1, 1]} : vector<4x8xf32> to vector<1x8xf32>
    %68 = vector.extract_strided_slice %12 {offsets = [1, 0], sizes = [1, 8], strides = [1, 1]} : vector<4x8xf32> to vector<1x8xf32>
    %69 = vector.extract_strided_slice %12 {offsets = [2, 0], sizes = [1, 8], strides = [1, 1]} : vector<4x8xf32> to vector<1x8xf32>
    %70 = vector.extract_strided_slice %12 {offsets = [3, 0], sizes = [1, 8], strides = [1, 1]} : vector<4x8xf32> to vector<1x8xf32>
    %71 = vector.extract_strided_slice %13 {offsets = [0, 0], sizes = [1, 8], strides = [1, 1]} : vector<2x8xf32> to vector<1x8xf32>
    %72 = vector.extract_strided_slice %13 {offsets = [1, 0], sizes = [1, 8], strides = [1, 1]} : vector<2x8xf32> to vector<1x8xf32>
    %73 = arith.mulf %67, %61 : vector<1x8xf32>
    %74 = arith.mulf %68, %66 : vector<1x8xf32>
    %75 = arith.addf %73, %74 : vector<1x8xf32>
    %76 = arith.mulf %67, %66 : vector<1x8xf32>
    %77 = arith.mulf %68, %63 : vector<1x8xf32>
    %78 = arith.addf %76, %77 : vector<1x8xf32>
    %79 = arith.mulf %69, %61 : vector<1x8xf32>
    %80 = arith.mulf %70, %66 : vector<1x8xf32>
    %81 = arith.addf %79, %80 : vector<1x8xf32>
    %82 = arith.mulf %69, %66 : vector<1x8xf32>
    %83 = arith.mulf %70, %63 : vector<1x8xf32>
    %84 = arith.addf %82, %83 : vector<1x8xf32>
    %85 = arith.mulf %75, %34 : vector<1x8xf32>
    %86 = arith.subf %71, %85 : vector<1x8xf32>
    %87 = arith.mulf %78, %35 : vector<1x8xf32>
    %88 = arith.subf %86, %87 : vector<1x8xf32>
    %89 = arith.mulf %81, %34 : vector<1x8xf32>
    %90 = arith.subf %72, %89 : vector<1x8xf32>
    %91 = arith.mulf %84, %35 : vector<1x8xf32>
    %92 = arith.subf %90, %91 : vector<1x8xf32>
    %93 = tpu.concatenate %75, %78, %81, %84, %88, %92 in 0 : vector<1x8xf32>, vector<1x8xf32>, vector<1x8xf32>, vector<1x8xf32>, vector<1x8xf32>, vector<1x8xf32> -> vector<6x8xf32>
    %cst_31 = arith.constant dense<0.000000e+00> : vector<6x128xf32>
    %94 = tpu.matmul %93, %14, %cst_31 {dimension_numbers = #tpu.dot_dimension_numbers<[1], [0], [0], [1], [0, 0, 1, 1], [], []>} : vector<6x8xf32>, vector<8x128xf32>, vector<6x128xf32> -> vector<6x128xf32>
    %95 = vector.extract_strided_slice %94 {offsets = [0, 0], sizes = [1, 128], strides = [1, 1]} : vector<6x128xf32> to vector<1x128xf32>
    %96 = vector.broadcast %95 : vector<1x128xf32> to vector<32x128xf32>
    %97 = arith.mulf %96, %15 : vector<32x128xf32>
    %98 = vector.extract_strided_slice %94 {offsets = [1, 0], sizes = [1, 128], strides = [1, 1]} : vector<6x128xf32> to vector<1x128xf32>
    %99 = vector.broadcast %98 : vector<1x128xf32> to vector<32x128xf32>
    %100 = arith.mulf %99, %16 : vector<32x128xf32>
    %101 = arith.addf %97, %100 : vector<32x128xf32>
    %102 = vector.extract_strided_slice %94 {offsets = [4, 0], sizes = [1, 128], strides = [1, 1]} : vector<6x128xf32> to vector<1x128xf32>
    %103 = vector.broadcast %102 : vector<1x128xf32> to vector<32x128xf32>
    %104 = arith.addf %101, %103 : vector<32x128xf32>
    %cst_32 = arith.constant 0.000000e+00 : f32
    %105 = vector.broadcast %cst_32 : f32 to vector<32x128xf32>
    %106 = arith.maximumf %104, %105 : vector<32x128xf32>
    %107 = vector.extract_strided_slice %94 {offsets = [2, 0], sizes = [1, 128], strides = [1, 1]} : vector<6x128xf32> to vector<1x128xf32>
    %108 = vector.broadcast %107 : vector<1x128xf32> to vector<32x128xf32>
    %109 = arith.mulf %108, %15 : vector<32x128xf32>
    %110 = vector.extract_strided_slice %94 {offsets = [3, 0], sizes = [1, 128], strides = [1, 1]} : vector<6x128xf32> to vector<1x128xf32>
    %111 = vector.broadcast %110 : vector<1x128xf32> to vector<32x128xf32>
    %112 = arith.mulf %111, %16 : vector<32x128xf32>
    %113 = arith.addf %109, %112 : vector<32x128xf32>
    %114 = vector.extract_strided_slice %94 {offsets = [5, 0], sizes = [1, 128], strides = [1, 1]} : vector<6x128xf32> to vector<1x128xf32>
    %115 = vector.broadcast %114 : vector<1x128xf32> to vector<32x128xf32>
    %116 = arith.addf %113, %115 : vector<32x128xf32>
    %cst_33 = arith.constant 0.000000e+00 : f32
    %117 = vector.broadcast %cst_33 : f32 to vector<32x128xf32>
    %118 = arith.maximumf %116, %117 : vector<32x128xf32>
    %119 = vector.shape_cast %106 : vector<32x128xf32> to vector<2x16x128xf32>
    %120 = vector.shape_cast %118 : vector<32x128xf32> to vector<2x16x128xf32>
    %c0_34 = arith.constant 0 : index
    %c1_35 = arith.constant 1 : index
    %c0_36 = arith.constant 0 : index
    %121 = vector.load %arg12[%c0_34, %c1_35, %c0_36] : memref<2x18x256xf32, #tpu.memory_space<vmem>>, vector<2x16x128xf32>
    tpu.vector_store %arg12[%c0_34, %c1_35, %c0_36], %119 {strides = array<i32>} : memref<2x18x256xf32, #tpu.memory_space<vmem>>, vector<2x16x128xf32>,
    %c0_37 = arith.constant 0 : index
    %c1_38 = arith.constant 1 : index
    %c128_39 = arith.constant 128 : index
    %122 = vector.load %arg12[%c0_37, %c1_38, %c128_39] : memref<2x18x256xf32, #tpu.memory_space<vmem>>, vector<2x16x128xf32>
    tpu.vector_store %arg12[%c0_37, %c1_38, %c128_39], %120 {strides = array<i32>} : memref<2x18x256xf32, #tpu.memory_space<vmem>>, vector<2x16x128xf32>,
    %123 = vector.extract_strided_slice %119 {offsets = [0, 0, 0], sizes = [2, 1, 128], strides = [1, 1, 1]} : vector<2x16x128xf32> to vector<2x1x128xf32>
    %c0_40 = arith.constant 0 : index
    %c0_41 = arith.constant 0 : index
    %c0_42 = arith.constant 0 : index
    %124 = vector.load %arg12[%c0_40, %c0_41, %c0_42] : memref<2x18x256xf32, #tpu.memory_space<vmem>>, vector<2x1x128xf32>
    tpu.vector_store %arg12[%c0_40, %c0_41, %c0_42], %123 {strides = array<i32>} : memref<2x18x256xf32, #tpu.memory_space<vmem>>, vector<2x1x128xf32>,
    %125 = vector.extract_strided_slice %120 {offsets = [0, 0, 0], sizes = [2, 1, 128], strides = [1, 1, 1]} : vector<2x16x128xf32> to vector<2x1x128xf32>
    %c0_43 = arith.constant 0 : index
    %c0_44 = arith.constant 0 : index
    %c128_45 = arith.constant 128 : index
    %126 = vector.load %arg12[%c0_43, %c0_44, %c128_45] : memref<2x18x256xf32, #tpu.memory_space<vmem>>, vector<2x1x128xf32>
    tpu.vector_store %arg12[%c0_43, %c0_44, %c128_45], %125 {strides = array<i32>} : memref<2x18x256xf32, #tpu.memory_space<vmem>>, vector<2x1x128xf32>,
    %127 = vector.extract_strided_slice %119 {offsets = [0, 15, 0], sizes = [2, 1, 128], strides = [1, 1, 1]} : vector<2x16x128xf32> to vector<2x1x128xf32>
    %c0_46 = arith.constant 0 : index
    %c17 = arith.constant 17 : index
    %c0_47 = arith.constant 0 : index
    %128 = vector.load %arg12[%c0_46, %c17, %c0_47] : memref<2x18x256xf32, #tpu.memory_space<vmem>>, vector<2x1x128xf32>
    tpu.vector_store %arg12[%c0_46, %c17, %c0_47], %127 {strides = array<i32>} : memref<2x18x256xf32, #tpu.memory_space<vmem>>, vector<2x1x128xf32>,
    %129 = vector.extract_strided_slice %120 {offsets = [0, 15, 0], sizes = [2, 1, 128], strides = [1, 1, 1]} : vector<2x16x128xf32> to vector<2x1x128xf32>
    %c0_48 = arith.constant 0 : index
    %c17_49 = arith.constant 17 : index
    %c128_50 = arith.constant 128 : index
    %130 = vector.load %arg12[%c0_48, %c17_49, %c128_50] : memref<2x18x256xf32, #tpu.memory_space<vmem>>, vector<2x1x128xf32>
    tpu.vector_store %arg12[%c0_48, %c17_49, %c128_50], %129 {strides = array<i32>} : memref<2x18x256xf32, #tpu.memory_space<vmem>>, vector<2x1x128xf32>,
    %c0_51 = arith.constant 0 : index
    %c0_52 = arith.constant 0 : index
    %c0_53 = arith.constant 0 : index
    %131 = vector.load %arg12[%c0_51, %c0_52, %c0_53] : memref<2x18x256xf32, #tpu.memory_space<vmem>>, vector<2x16x256xf32>
    %132 = vector.shape_cast %131 : vector<2x16x256xf32> to vector<32x256xf32>
    %c0_54 = arith.constant 0 : index
    %c0_55 = arith.constant 0 : index
    %133 = vector.load %arg11[%c0_54, %c0_55] : memref<32x768xf32, #tpu.memory_space<vmem>>, vector<32x256xf32>
    tpu.vector_store %arg11[%c0_54, %c0_55], %132 {strides = array<i32>} : memref<32x768xf32, #tpu.memory_space<vmem>>, vector<32x256xf32>,
    %c0_56 = arith.constant 0 : index
    %c1_57 = arith.constant 1 : index
    %c0_58 = arith.constant 0 : index
    %134 = vector.load %arg12[%c0_56, %c1_57, %c0_58] : memref<2x18x256xf32, #tpu.memory_space<vmem>>, vector<2x16x256xf32>
    %135 = vector.shape_cast %134 : vector<2x16x256xf32> to vector<32x256xf32>
    %c0_59 = arith.constant 0 : index
    %c256_60 = arith.constant 256 : index
    %136 = vector.load %arg11[%c0_59, %c256_60] : memref<32x768xf32, #tpu.memory_space<vmem>>, vector<32x256xf32>
    tpu.vector_store %arg11[%c0_59, %c256_60], %135 {strides = array<i32>} : memref<32x768xf32, #tpu.memory_space<vmem>>, vector<32x256xf32>,
    %c0_61 = arith.constant 0 : index
    %c2_62 = arith.constant 2 : index
    %c0_63 = arith.constant 0 : index
    %137 = vector.load %arg12[%c0_61, %c2_62, %c0_63] : memref<2x18x256xf32, #tpu.memory_space<vmem>>, vector<2x16x256xf32>
    %138 = vector.shape_cast %137 : vector<2x16x256xf32> to vector<32x256xf32>
    %c0_64 = arith.constant 0 : index
    %c512 = arith.constant 512 : index
    %139 = vector.load %arg11[%c0_64, %c512] : memref<32x768xf32, #tpu.memory_space<vmem>>, vector<32x256xf32>
    tpu.vector_store %arg11[%c0_64, %c512], %138 {strides = array<i32>} : memref<32x768xf32, #tpu.memory_space<vmem>>, vector<32x256xf32>,
    %c0_65 = arith.constant 0 : index
    %c0_66 = arith.constant 0 : index
    %140 = vector.load %arg11[%c0_65, %c0_66] : memref<32x768xf32, #tpu.memory_space<vmem>>, vector<32x768xf32>
    %c0_67 = arith.constant 0 : index
    %c0_68 = arith.constant 0 : index
    %141 = vector.load %arg5[%c0_67, %c0_68] : memref<768x256xf32, #tpu.memory_space<vmem>>, vector<768x256xf32>
    %cst_69 = arith.constant dense<0.000000e+00> : vector<32x256xf32>
    %142 = tpu.matmul %140, %141, %cst_69 {dimension_numbers = #tpu.dot_dimension_numbers<[1], [0], [0], [1], [0, 0, 1, 1], [], []>} : vector<32x768xf32>, vector<768x256xf32>, vector<32x256xf32> -> vector<32x256xf32>
    %c0_70 = arith.constant 0 : index
    %c0_71 = arith.constant 0 : index
    %143 = vector.load %arg6[%c0_70, %c0_71] : memref<4x8xf32, #tpu.memory_space<vmem>>, vector<4x8xf32>
    %c0_72 = arith.constant 0 : index
    %c0_73 = arith.constant 0 : index
    %144 = vector.load %arg7[%c0_72, %c0_73] : memref<2x8xf32, #tpu.memory_space<vmem>>, vector<2x8xf32>
    %c0_74 = arith.constant 0 : index
    %c0_75 = arith.constant 0 : index
    %145 = vector.load %arg8[%c0_74, %c0_75] : memref<8x128xf32, #tpu.memory_space<vmem>>, vector<8x128xf32>
    %146 = vector.extract_strided_slice %142 {offsets = [0, 0], sizes = [32, 128], strides = [1, 1]} : vector<32x256xf32> to vector<32x128xf32>
    %147 = vector.extract_strided_slice %142 {offsets = [0, 128], sizes = [32, 128], strides = [1, 1]} : vector<32x256xf32> to vector<32x128xf32>
    %cst_76 = arith.constant dense<0.000000e+00> : vector<128xf32>
    %148 = vector.multi_reduction <add>, %146, %cst_76 [0] : vector<32x128xf32> to vector<128xf32>
    %149 = vector.shape_cast %148 : vector<128xf32> to vector<1x128xf32>
    %cst_77 = arith.constant dense<0.000000e+00> : vector<128xf32>
    %150 = vector.multi_reduction <add>, %147, %cst_77 [0] : vector<32x128xf32> to vector<128xf32>
    %151 = vector.shape_cast %150 : vector<128xf32> to vector<1x128xf32>
    %152 = arith.mulf %146, %146 : vector<32x128xf32>
    %cst_78 = arith.constant dense<0.000000e+00> : vector<128xf32>
    %153 = vector.multi_reduction <add>, %152, %cst_78 [0] : vector<32x128xf32> to vector<128xf32>
    %154 = vector.shape_cast %153 : vector<128xf32> to vector<1x128xf32>
    %155 = arith.mulf %147, %147 : vector<32x128xf32>
    %cst_79 = arith.constant dense<0.000000e+00> : vector<128xf32>
    %156 = vector.multi_reduction <add>, %155, %cst_79 [0] : vector<32x128xf32> to vector<128xf32>
    %157 = vector.shape_cast %156 : vector<128xf32> to vector<1x128xf32>
    %158 = arith.mulf %146, %147 : vector<32x128xf32>
    %cst_80 = arith.constant dense<0.000000e+00> : vector<128xf32>
    %159 = vector.multi_reduction <add>, %158, %cst_80 [0] : vector<32x128xf32> to vector<128xf32>
    %160 = vector.shape_cast %159 : vector<128xf32> to vector<1x128xf32>
    %161 = tpu.concatenate %149, %151, %154, %157, %160 in 0 : vector<1x128xf32>, vector<1x128xf32>, vector<1x128xf32>, vector<1x128xf32>, vector<1x128xf32> -> vector<5x128xf32>
    %cst_81 = arith.constant dense<0.000000e+00> : vector<5x8xf32>
    %162 = tpu.matmul %161, %145, %cst_81 {dimension_numbers = #tpu.dot_dimension_numbers<[1], [1], [0], [0], [0, 0, 1, 0], [], []>} : vector<5x128xf32>, vector<8x128xf32>, vector<5x8xf32> -> vector<5x8xf32>
    %cst_82 = arith.constant 0.001953125 : f32
    %163 = vector.broadcast %cst_82 : f32 to vector<5x8xf32>
    %164 = arith.mulf %162, %163 : vector<5x8xf32>
    %165 = vector.extract_strided_slice %164 {offsets = [0, 0], sizes = [1, 8], strides = [1, 1]} : vector<5x8xf32> to vector<1x8xf32>
    %166 = vector.extract_strided_slice %164 {offsets = [1, 0], sizes = [1, 8], strides = [1, 1]} : vector<5x8xf32> to vector<1x8xf32>
    %167 = vector.extract_strided_slice %164 {offsets = [2, 0], sizes = [1, 8], strides = [1, 1]} : vector<5x8xf32> to vector<1x8xf32>
    %168 = arith.mulf %165, %165 : vector<1x8xf32>
    %169 = arith.subf %167, %168 : vector<1x8xf32>
    %cst_83 = arith.constant 9.99999974E-6 : f32
    %170 = vector.broadcast %cst_83 : f32 to vector<1x8xf32>
    %171 = arith.addf %169, %170 : vector<1x8xf32>
    %172 = vector.extract_strided_slice %164 {offsets = [3, 0], sizes = [1, 8], strides = [1, 1]} : vector<5x8xf32> to vector<1x8xf32>
    %173 = arith.mulf %166, %166 : vector<1x8xf32>
    %174 = arith.subf %172, %173 : vector<1x8xf32>
    %cst_84 = arith.constant 9.99999974E-6 : f32
    %175 = vector.broadcast %cst_84 : f32 to vector<1x8xf32>
    %176 = arith.addf %174, %175 : vector<1x8xf32>
    %177 = vector.extract_strided_slice %164 {offsets = [4, 0], sizes = [1, 8], strides = [1, 1]} : vector<5x8xf32> to vector<1x8xf32>
    %178 = arith.mulf %165, %166 : vector<1x8xf32>
    %179 = arith.subf %177, %178 : vector<1x8xf32>
    %180 = arith.mulf %171, %176 : vector<1x8xf32>
    %181 = arith.mulf %179, %179 : vector<1x8xf32>
    %182 = arith.subf %180, %181 : vector<1x8xf32>
    %183 = math.sqrt %182 : vector<1x8xf32>
    %184 = arith.addf %171, %176 : vector<1x8xf32>
    %cst_85 = arith.constant 2.000000e+00 : f32
    %185 = vector.broadcast %cst_85 : f32 to vector<1x8xf32>
    %186 = arith.mulf %185, %183 : vector<1x8xf32>
    %187 = arith.addf %184, %186 : vector<1x8xf32>
    %188 = math.sqrt %187 : vector<1x8xf32>
    %189 = arith.mulf %183, %188 : vector<1x8xf32>
    %190 = tpu.reciprocal %189 : vector<1x8xf32> -> vector<1x8xf32>
    %191 = arith.addf %176, %183 : vector<1x8xf32>
    %192 = arith.mulf %191, %190 : vector<1x8xf32>
    %193 = arith.addf %171, %183 : vector<1x8xf32>
    %194 = arith.mulf %193, %190 : vector<1x8xf32>
    %cst_86 = arith.constant 0.000000e+00 : f32
    %195 = vector.broadcast %cst_86 : f32 to vector<1x8xf32>
    %196 = arith.subf %195, %179 : vector<1x8xf32>
    %197 = arith.mulf %196, %190 : vector<1x8xf32>
    %198 = vector.extract_strided_slice %143 {offsets = [0, 0], sizes = [1, 8], strides = [1, 1]} : vector<4x8xf32> to vector<1x8xf32>
    %199 = vector.extract_strided_slice %143 {offsets = [1, 0], sizes = [1, 8], strides = [1, 1]} : vector<4x8xf32> to vector<1x8xf32>
    %200 = vector.extract_strided_slice %143 {offsets = [2, 0], sizes = [1, 8], strides = [1, 1]} : vector<4x8xf32> to vector<1x8xf32>
    %201 = vector.extract_strided_slice %143 {offsets = [3, 0], sizes = [1, 8], strides = [1, 1]} : vector<4x8xf32> to vector<1x8xf32>
    %202 = vector.extract_strided_slice %144 {offsets = [0, 0], sizes = [1, 8], strides = [1, 1]} : vector<2x8xf32> to vector<1x8xf32>
    %203 = vector.extract_strided_slice %144 {offsets = [1, 0], sizes = [1, 8], strides = [1, 1]} : vector<2x8xf32> to vector<1x8xf32>
    %204 = arith.mulf %198, %192 : vector<1x8xf32>
    %205 = arith.mulf %199, %197 : vector<1x8xf32>
    %206 = arith.addf %204, %205 : vector<1x8xf32>
    %207 = arith.mulf %198, %197 : vector<1x8xf32>
    %208 = arith.mulf %199, %194 : vector<1x8xf32>
    %209 = arith.addf %207, %208 : vector<1x8xf32>
    %210 = arith.mulf %200, %192 : vector<1x8xf32>
    %211 = arith.mulf %201, %197 : vector<1x8xf32>
    %212 = arith.addf %210, %211 : vector<1x8xf32>
    %213 = arith.mulf %200, %197 : vector<1x8xf32>
    %214 = arith.mulf %201, %194 : vector<1x8xf32>
    %215 = arith.addf %213, %214 : vector<1x8xf32>
    %216 = arith.mulf %206, %165 : vector<1x8xf32>
    %217 = arith.subf %202, %216 : vector<1x8xf32>
    %218 = arith.mulf %209, %166 : vector<1x8xf32>
    %219 = arith.subf %217, %218 : vector<1x8xf32>
    %220 = arith.mulf %212, %165 : vector<1x8xf32>
    %221 = arith.subf %203, %220 : vector<1x8xf32>
    %222 = arith.mulf %215, %166 : vector<1x8xf32>
    %223 = arith.subf %221, %222 : vector<1x8xf32>
    %224 = tpu.concatenate %206, %209, %212, %215, %219, %223 in 0 : vector<1x8xf32>, vector<1x8xf32>, vector<1x8xf32>, vector<1x8xf32>, vector<1x8xf32>, vector<1x8xf32> -> vector<6x8xf32>
    %cst_87 = arith.constant dense<0.000000e+00> : vector<6x128xf32>
    %225 = tpu.matmul %224, %145, %cst_87 {dimension_numbers = #tpu.dot_dimension_numbers<[1], [0], [0], [1], [0, 0, 1, 1], [], []>} : vector<6x8xf32>, vector<8x128xf32>, vector<6x128xf32> -> vector<6x128xf32>
    %226 = vector.extract_strided_slice %225 {offsets = [0, 0], sizes = [1, 128], strides = [1, 1]} : vector<6x128xf32> to vector<1x128xf32>
    %227 = vector.broadcast %226 : vector<1x128xf32> to vector<32x128xf32>
    %228 = arith.mulf %227, %146 : vector<32x128xf32>
    %229 = vector.extract_strided_slice %225 {offsets = [1, 0], sizes = [1, 128], strides = [1, 1]} : vector<6x128xf32> to vector<1x128xf32>
    %230 = vector.broadcast %229 : vector<1x128xf32> to vector<32x128xf32>
    %231 = arith.mulf %230, %147 : vector<32x128xf32>
    %232 = arith.addf %228, %231 : vector<32x128xf32>
    %233 = vector.extract_strided_slice %225 {offsets = [4, 0], sizes = [1, 128], strides = [1, 1]} : vector<6x128xf32> to vector<1x128xf32>
    %234 = vector.broadcast %233 : vector<1x128xf32> to vector<32x128xf32>
    %235 = arith.addf %232, %234 : vector<32x128xf32>
    %cst_88 = arith.constant 0.000000e+00 : f32
    %236 = vector.broadcast %cst_88 : f32 to vector<32x128xf32>
    %237 = arith.maximumf %235, %236 : vector<32x128xf32>
    %238 = vector.extract_strided_slice %225 {offsets = [2, 0], sizes = [1, 128], strides = [1, 1]} : vector<6x128xf32> to vector<1x128xf32>
    %239 = vector.broadcast %238 : vector<1x128xf32> to vector<32x128xf32>
    %240 = arith.mulf %239, %146 : vector<32x128xf32>
    %241 = vector.extract_strided_slice %225 {offsets = [3, 0], sizes = [1, 128], strides = [1, 1]} : vector<6x128xf32> to vector<1x128xf32>
    %242 = vector.broadcast %241 : vector<1x128xf32> to vector<32x128xf32>
    %243 = arith.mulf %242, %147 : vector<32x128xf32>
    %244 = arith.addf %240, %243 : vector<32x128xf32>
    %245 = vector.extract_strided_slice %225 {offsets = [5, 0], sizes = [1, 128], strides = [1, 1]} : vector<6x128xf32> to vector<1x128xf32>
    %246 = vector.broadcast %245 : vector<1x128xf32> to vector<32x128xf32>
    %247 = arith.addf %244, %246 : vector<32x128xf32>
    %cst_89 = arith.constant 0.000000e+00 : f32
    %248 = vector.broadcast %cst_89 : f32 to vector<32x128xf32>
    %249 = arith.maximumf %247, %248 : vector<32x128xf32>
    %c0_90 = arith.constant 0 : index
    %c0_91 = arith.constant 0 : index
    %250 = vector.load %arg9[%c0_90, %c0_91] : memref<32x256xf32, #tpu.memory_space<vmem>>, vector<32x128xf32>
    tpu.vector_store %arg9[%c0_90, %c0_91], %237 {strides = array<i32>} : memref<32x256xf32, #tpu.memory_space<vmem>>, vector<32x128xf32>,
    %c0_92 = arith.constant 0 : index
    %c128_93 = arith.constant 128 : index
    %251 = vector.load %arg9[%c0_92, %c128_93] : memref<32x256xf32, #tpu.memory_space<vmem>>, vector<32x128xf32>
    tpu.vector_store %arg9[%c0_92, %c128_93], %249 {strides = array<i32>} : memref<32x256xf32, #tpu.memory_space<vmem>>, vector<32x128xf32>,
    return
  }
}

</mosaic_0001>

<bundles_post_ra>
// kernel: tpu_custom_call.1
= control target key start
LH: loop header
LB: loop body
LE: loop exit
PB: predicated region body
PF: predicated region fallthrough
CT: control target
= control target key end

     0   :  { %14 = vsyncpa [#allocation6], 0  ;;  %s2755_s0 = inlined_call_operand.vmem [shape: f32[2,18,128], index: 0, kind: input, shape index: {}]   ;;  %s2756_s1 = inlined_call_operand.hbm [shape: f32[384,256], index: 1, kind: input, shape index: {}]   ;;  %s2757_s2 = inlined_call_operand.vmem [shape: f32[4,8], index: 2, kind: input, shape index: {}]   ;;  %s2758_s3 = inlined_call_operand.vmem [shape: f32[2,8], index: 3, kind: input, shape index: {}]   ;;  %s2759_s4 = inlined_call_operand.vmem [shape: f32[8,128], index: 4, kind: input, shape index: {}]   ;;  %s2760_s5 = inlined_call_operand.hbm [shape: f32[768,256], index: 5, kind: input, shape index: {}]   ;;  %s2761_s6 = inlined_call_operand.vmem [shape: f32[4,8], index: 6, kind: input, shape index: {}]   ;;  %s2762_s7 = inlined_call_operand.vmem [shape: f32[2,8], index: 7, kind: input, shape index: {}]   ;;  %s2763_s8 = inlined_call_operand.vmem [shape: f32[8,128], index: 8, kind: input, shape index: {}]   ;;  %s2764_s9 = inlined_call_operand.hbm [shape: f32[32,256], index: 9, kind: output, shape index: {}]  }
   0x1   :  { %15 = vsyncpa [#allocation9], 0 }
   0x2   :  { %16 = vsyncpa [#allocation7], 0  ;;  %s2321_s30 = smov [#allocation5]   ;;  %s2249_s13 = scalar_lea.hbm %s2756_s1, 12288 }
   0x3   :  { %s24_s10 = sshll.u32 %s2321_s30, 4  ;;  %p2250_p0 = scmp.ne.s32.totalorder %s2756_s1, %s2249_s13  ;;  %s25_s10 = int_to_ptr.vmem [resolvable:$true] %s24_s10 }
   0x4   :  { %p2253_p1 = scmp.lt.u32.totalorder %s2249_s13, %s2756_s1 }
   0x6   :  { %p2255_p2 = pnand %p2253_p1, %p2250_p0 }
   0x8   :  { %2258 = shalt.err (!%p2255_p2)
}
   0x9   :  { %s2259_s18 = scalar_lea.vmem %s25_s10, 12288  ;;  %p2264_p4 = scmp.lt.s32.totalorder %s25_s10, %s25_s10 }
   0xa   :  { %p2260_p3 = scmp.ne.s32.totalorder %s25_s10, %s2259_s18  ;;  %p2265_p5 = scmp.lt.s32.totalorder %s2259_s18, %s2259_s18 }
   0xc   :  { %p2266_p6 = por %p2265_p5, %p2264_p4 }
   0xe   :  { %p2267_p7 = pnand %p2266_p6, %p2260_p3 }
  0x10   :  { %2270 = shalt.err (!%p2267_p7)
}
  0x11   :  { %s2322_s19 = smov 256   ;;  %s2323_s20 = smov 16  }
  0x12   :  { %30 = dma.hbm_to_vmem [thread:$0]  %s2756_s1, 12288, %s25_s10, [#allocation6], %s2322_s19, %s2322_s19, %s2323_s20  }
  0x13   :  { %s2324_s23 = smov [#allocation8]   ;;  %s2271_s27 = scalar_lea.hbm %s2760_s5, 24576 }
  0x14   :  { %s42_s24 = sshll.u32 %s2324_s23, 4  ;;  %p2272_p8 = scmp.ne.s32.totalorder %s2760_s5, %s2271_s27  ;;  %s43_s24 = int_to_ptr.vmem [resolvable:$true] %s42_s24 }
  0x15   :  { %p2275_p9 = scmp.lt.u32.totalorder %s2271_s27, %s2760_s5 }
  0x17   :  { %p2277_p10 = pnand %p2275_p9, %p2272_p8 }
  0x19   :  { %2280 = shalt.err (!%p2277_p10)
}
  0x1a   :  { %s2281_s12 = scalar_lea.vmem %s43_s24, 24576  ;;  %p2286_p12 = scmp.lt.s32.totalorder %s43_s24, %s43_s24 }
  0x1b   :  { %p2282_p11 = scmp.ne.s32.totalorder %s43_s24, %s2281_s12  ;;  %p2287_p13 = scmp.lt.s32.totalorder %s2281_s12, %s2281_s12 }
  0x1d   :  { %p2288_p0 = por %p2287_p13, %p2286_p12 }
  0x1f   :  { %p2289_p1 = pnand %p2288_p0, %p2282_p11 }
  0x21   :  { %2292 = shalt.err (!%p2289_p1)
}
  0x22   :  { %48 = dma.hbm_to_vmem [thread:$0]  %s2760_s5, 24576, %s43_s24, [#allocation9], %s2322_s19, %s2322_s19, %s2323_s20  }
  0x23   :  { %2315 = dma.done.wait [#allocation6], 12288  }
  0x24   :  { %2316 = vsyncadd [#allocation6], 4294955008 }
  0x25   :  { %2317 = dma.done.wait [#allocation9], 24576  }
  0x26   :  { %2318 = vsyncadd [#allocation9], 4294942720  ;;  %v2325_v0 = vmov 0.0   ;;  %v98_v1 = vld [vmem:[#allocation5 + $0x8] sm:$0xff]  ;;  %v100_v2 = vld [vmem:[#allocation5 + $0x18] sm:$0xff]  ;;  %vm2326_vm0 = vmmov 0  }
  0x27   :  { %1898 = vmatprep.subr.mxu1 %v2325_v0  ;;  %v97_v3 = vld [vmem:[#allocation5] sm:$0xff]  ;;  %v1918_v4 = vpack.c.bf16 %v100_v2, %v98_v1  ;;  %v99_v5 = vld [vmem:[#allocation5 + $0x10] sm:$0xff]  ;;  %v102_v6 = vld [vmem:[#allocation5 + $0x28] sm:$0xff]  ;;  %1900 = vmatprep.mubr.msk.f32.mxu1 %vm2326_vm0, %v2325_v0  ;;  %vm431_vm1 = vcmask 1040384   ;;  %vm433_vm2 = vcmask 1041408   ;;  %vm435_vm3 = vcmask 1042432  }
  0x28   :  { %v104_v7 = vld [vmem:[#allocation5 + $0x38] sm:$0xff]  ;;  %v1920_v8 = vpack.c.bf16 %v99_v5, %v97_v3  ;;  %v101_v10 = vld [vmem:[#allocation5 + $0x20] sm:$0xff]  ;;  %v103_v11 = vld [vmem:[#allocation5 + $0x30] sm:$0xff]  ;;  %vm437_vm4 = vcmask 1043456   ;;  %vm643_vm9 = vcmask 1044480   ;;  %vm645_vm10 = vcmask 64512  }
  0x29   :  { %v1922_v9 = vpack.c.bf16 %v104_v7, %v102_v6  ;;  %v106_v12 = vld [vmem:[#allocation5 + $0x48] sm:$0xff]  ;;  %1919 = vmatprep.subr.bf16.mxu0 %v1918_v4  ;;  %v108_v13 = vld [vmem:[#allocation5 + $0x58] sm:$0xff]  ;;  %v1924_v14 = vpack.c.bf16 %v103_v11, %v101_v10  ;;  %v105_v16 = vld [vmem:[#allocation5 + $0x40] sm:$0xff]  ;;  %vm875_vm11 = vcmask 1046528   ;;  %vm936_vm12 = vcmask 1045504  }
  0x2a   :  { %1921 = vmatpush1.bf16.msra.mxu0 %v1920_v8  ;;  %v1926_v15 = vpack.c.bf16 %v108_v13, %v106_v12  ;;  %v107_v17 = vld [vmem:[#allocation5 + $0x50] sm:$0xff]  ;;  %v110_v18 = vld [vmem:[#allocation5 + $0x68] sm:$0xff]  ;;  %v112_v19 = vld [vmem:[#allocation5 + $0x78] sm:$0xff] }
  0x2b   :  { %1923 = vmatprep.subr.bf16.mxu0 %v1922_v9  ;;  %v1928_v20 = vpack.c.bf16 %v107_v17, %v105_v16  ;;  %v1930_v21 = vpack.c.bf16 %v112_v19, %v110_v18  ;;  %v109_v22 = vld [vmem:[#allocation5 + $0x60] sm:$0xff]  ;;  %v111_v23 = vld [vmem:[#allocation5 + $0x70] sm:$0xff]  ;;  %v114_v24 = vld [vmem:[#allocation5 + $0x88] sm:$0xff] }
  0x2c   :  { %v116_v25 = vld [vmem:[#allocation5 + $0x98] sm:$0xff]  ;;  %v1932_v26 = vpack.c.bf16 %v111_v23, %v109_v22  ;;  %v113_v28 = vld [vmem:[#allocation5 + $0x80] sm:$0xff]  ;;  %v115_v29 = vld [vmem:[#allocation5 + $0x90] sm:$0xff] }
  0x2d   :  { %v1934_v27 = vpack.c.bf16 %v116_v25, %v114_v24  ;;  %v118_v30 = vld [vmem:[#allocation5 + $0xa8] sm:$0xff]  ;;  %v120_v31 = vld [vmem:[#allocation5 + $0xb8] sm:$0xff]  ;;  %v1936_v32 = vpack.c.bf16 %v115_v29, %v113_v28  ;;  %v117_v34 = vld [vmem:[#allocation5 + $0xa0] sm:$0xff] }
  0x2e   :  { %1925 = vmatpush1.bf16.msra.mxu0 %v1924_v14  ;;  %v1938_v33 = vpack.c.bf16 %v120_v31, %v118_v30  ;;  %v119_v35 = vld [vmem:[#allocation5 + $0xb0] sm:$0xff]  ;;  %v122_v36 = vld [vmem:[#allocation5 + $0xc8] sm:$0xff]  ;;  %v124_v37 = vld [vmem:[#allocation5 + $0xd8] sm:$0xff] }
  0x2f   :  { %1927 = vmatprep.subr.bf16.mxu0 %v1926_v15  ;;  %v1940_v38 = vpack.c.bf16 %v119_v35, %v117_v34  ;;  %v1942_v39 = vpack.c.bf16 %v124_v37, %v122_v36  ;;  %v121_v40 = vld [vmem:[#allocation5 + $0xc0] sm:$0xff]  ;;  %v123_v41 = vld [vmem:[#allocation5 + $0xd0] sm:$0xff]  ;;  %v126_v43 = vld [vmem:[#allocation5 + $0xe8] sm:$0xff] }
  0x30   :  { %v69_v42 = vld [vmem:[%s2755_s0 + $0x1] sm:$0xff]  ;;  %v1944_v45 = vpack.c.bf16 %v123_v41, %v121_v40  ;;  %v125_v47 = vld [vmem:[#allocation5 + $0xe0] sm:$0xff]  ;;  %v130_v49 = vld [vmem:[#allocation5 + $0x108] sm:$0xff] }
  0x31   :  { %v128_v44 = vld [vmem:[#allocation5 + $0xf8] sm:$0xff]  ;;  %257 = vmatprep.mubr.f32.mxu0 %v69_v42  ;;  %v127_v48 = vld [vmem:[#allocation5 + $0xf0] sm:$0xff]  ;;  %v129_v53 = vld [vmem:[#allocation5 + $0x100] sm:$0xff] }
  0x32   :  { %1929 = vmatpush1.bf16.msra.mxu0 %v1928_v20  ;;  %v1946_v46 = vpack.c.bf16 %v128_v44, %v126_v43  ;;  %v132_v50 = vld [vmem:[#allocation5 + $0x118] sm:$0xff]  ;;  %v1948_v51 = vpack.c.bf16 %v127_v48, %v125_v47  ;;  %v131_v54 = vld [vmem:[#allocation5 + $0x110] sm:$0xff]  ;;  %v134_v55 = vld [vmem:[#allocation5 + $0x128] sm:$0xff] }
  0x33   :  { %1931 = vmatprep.subr.bf16.mxu0 %v1930_v21  ;;  %v1950_v52 = vpack.c.bf16 %v132_v50, %v130_v49  ;;  %v136_v56 = vld [vmem:[#allocation5 + $0x138] sm:$0xff]  ;;  %v1952_v57 = vpack.c.bf16 %v131_v54, %v129_v53  ;;  %v133_v59 = vld [vmem:[#allocation5 + $0x120] sm:$0xff]  ;;  %v135_v60 = vld [vmem:[#allocation5 + $0x130] sm:$0xff] }
  0x34   :  { %v1954_v58 = vpack.c.bf16 %v136_v56, %v134_v55  ;;  %v138_v61 = vld [vmem:[#allocation5 + $0x148] sm:$0xff]  ;;  %v140_v62 = vld [vmem:[#allocation5 + $0x158] sm:$0xff]  ;;  %v1956_v63 = vpack.c.bf16 %v135_v60, %v133_v59  ;;  %v137_v2 = vld [vmem:[#allocation5 + $0x140] sm:$0xff] }
  0x35   :  { %v1958_v1 = vpack.c.bf16 %v140_v62, %v138_v61  ;;  %v139_v3 = vld [vmem:[#allocation5 + $0x150] sm:$0xff]  ;;  %v142_v4 = vld [vmem:[#allocation5 + $0x168] sm:$0xff]  ;;  %v144_v5 = vld [vmem:[#allocation5 + $0x178] sm:$0xff] }
  0x36   :  { %1933 = vmatpush1.bf16.msra.mxu0 %v1932_v26  ;;  %v1960_v6 = vpack.c.bf16 %v139_v3, %v137_v2  ;;  %v1962_v7 = vpack.c.bf16 %v144_v5, %v142_v4  ;;  %v141_v8 = vld [vmem:[#allocation5 + $0x160] sm:$0xff]  ;;  %v143_v9 = vld [vmem:[#allocation5 + $0x170] sm:$0xff]  ;;  %v146_v10 = vld [vmem:[#allocation5 + $0x188] sm:$0xff] }
  0x37   :  { %1935 = vmatprep.subr.bf16.mxu0 %v1934_v27  ;;  %v148_v11 = vld [vmem:[#allocation5 + $0x198] sm:$0xff]  ;;  %v1964_v12 = vpack.c.bf16 %v143_v9, %v141_v8  ;;  %v145_v14 = vld [vmem:[#allocation5 + $0x180] sm:$0xff]  ;;  %v147_v15 = vld [vmem:[#allocation5 + $0x190] sm:$0xff] }
  0x38   :  { %v1966_v13 = vpack.c.bf16 %v148_v11, %v146_v10  ;;  %v150_v16 = vld [vmem:[#allocation5 + $0x1a8] sm:$0xff]  ;;  %v152_v17 = vld [vmem:[#allocation5 + $0x1b8] sm:$0xff]  ;;  %v1968_v18 = vpack.c.bf16 %v147_v15, %v145_v14  ;;  %v149_v20 = vld [vmem:[#allocation5 + $0x1a0] sm:$0xff] }
  0x39   :  { %v1970_v19 = vpack.c.bf16 %v152_v17, %v150_v16  ;;  %v151_v21 = vld [vmem:[#allocation5 + $0x1b0] sm:$0xff]  ;;  %v154_v22 = vld [vmem:[#allocation5 + $0x1c8] sm:$0xff]  ;;  %v156_v23 = vld [vmem:[#allocation5 + $0x1d8] sm:$0xff] }
  0x3a   :  { %1937 = vmatpush1.bf16.msra.mxu0 %v1936_v32  ;;  %v1972_v24 = vpack.c.bf16 %v151_v21, %v149_v20  ;;  %v1974_v25 = vpack.c.bf16 %v156_v23, %v154_v22  ;;  %v153_v26 = vld [vmem:[#allocation5 + $0x1c0] sm:$0xff]  ;;  %v155_v27 = vld [vmem:[#allocation5 + $0x1d0] sm:$0xff]  ;;  %v158_v28 = vld [vmem:[#allocation5 + $0x1e8] sm:$0xff] }
  0x3b   :  { %1939 = vmatprep.subr.bf16.mxu0 %v1938_v33  ;;  %v160_v29 = vld [vmem:[#allocation5 + $0x1f8] sm:$0xff]  ;;  %v1976_v30 = vpack.c.bf16 %v155_v27, %v153_v26  ;;  %v157_v32 = vld [vmem:[#allocation5 + $0x1e0] sm:$0xff]  ;;  %v159_v33 = vld [vmem:[#allocation5 + $0x1f0] sm:$0xff] }
  0x3c   :  { %v1978_v31 = vpack.c.bf16 %v160_v29, %v158_v28  ;;  %v162_v34 = vld [vmem:[#allocation5 + $0x208] sm:$0xff]  ;;  %v164_v35 = vld [vmem:[#allocation5 + $0x218] sm:$0xff]  ;;  %v1980_v36 = vpack.c.bf16 %v159_v33, %v157_v32  ;;  %v61_v42 = vld [vmem:[%s2755_s0] sm:$0xff] }
  0x3d   :  { %v1982_v37 = vpack.c.bf16 %v164_v35, %v162_v34  ;;  %v166_v40 = vld [vmem:[#allocation5 + $0x228] sm:$0xff]  ;;  %v168_v41 = vld [vmem:[#allocation5 + $0x238] sm:$0xff]  ;;  %v169_v53 = vld [vmem:[#allocation5 + $0x240] sm:$0xff] }
  0x3e   :  { %1941 = vmatpush1.bf16.msra.mxu0 %v1940_v38  ;;  %v161_v38 = vld [vmem:[#allocation5 + $0x200] sm:$0xff]  ;;  %v1986_v44 = vpack.c.bf16 %v168_v41, %v166_v40  ;;  %v170_v48 = vld [vmem:[#allocation5 + $0x248] sm:$0xff]  ;;  %v172_v49 = vld [vmem:[#allocation5 + $0x258] sm:$0xff] }
  0x3f   :  { %1943 = vmatprep.subr.bf16.mxu0 %v1942_v39  ;;  %v163_v39 = vld [vmem:[#allocation5 + $0x210] sm:$0xff]  ;;  %v70_v47 = vld [vmem:[%s2755_s0 + $0x9] sm:$0xff]  ;;  %v174_v56 = vld [vmem:[#allocation5 + $0x268] sm:$0xff] }
  0x40   :  { %v1984_v43 = vpack.c.bf16 %v163_v39, %v161_v38  ;;  %v171_v54 = vld [vmem:[#allocation5 + $0x250] sm:$0xff]  ;;  %v63_v59 = vld [vmem:[%s2755_s0 + $0x18] sm:$0xff]  ;;  %v173_v61 = vld [vmem:[#allocation5 + $0x260] sm:$0xff] }
  0x41   :  { %v71_v55 = vld [vmem:[%s2755_s0 + $0x19] sm:$0xff]  ;;  %v180_v2 = vld [vmem:[#allocation5 + $0x298] sm:$0xff] }
  0x42   :  { %1945 = vmatpush1.bf16.msra.mxu0 %v1944_v45  ;;  %v165_v45 = vld [vmem:[#allocation5 + $0x220] sm:$0xff]  ;;  %v175_v62 = vld [vmem:[#allocation5 + $0x270] sm:$0xff]  ;;  %v182_v8 = vld [vmem:[#allocation5 + $0x2a8] sm:$0xff] }
  0x43   :  { %1947 = vmatprep.subr.bf16.mxu0 %v1946_v46  ;;  %v167_v46 = vld [vmem:[#allocation5 + $0x230] sm:$0xff]  ;;  %v1996_v3 = vpack.c.bf16 %v175_v62, %v173_v61  ;;  %v184_v9 = vld [vmem:[#allocation5 + $0x2b8] sm:$0xff]  ;;  %v186_v14 = vld [vmem:[#allocation5 + $0x2c8] sm:$0xff] }
  0x44   :  { %v1988_v50 = vpack.c.bf16 %v167_v46, %v165_v45  ;;  %v64_v4 = vld [vmem:[%s2755_s0 + $0x20] sm:$0xff]  ;;  %v2002_v11 = vpack.c.bf16 %v184_v9, %v182_v8  ;;  %v188_v15 = vld [vmem:[#allocation5 + $0x2d8] sm:$0xff]  ;;  %v190_v20 = vld [vmem:[#allocation5 + $0x2e8] sm:$0xff] }
  0x45   :  { %v2006_v17 = vpack.c.bf16 %v188_v15, %v186_v14  ;;  %v192_v21 = vld [vmem:[#allocation5 + $0x2f8] sm:$0xff]  ;;  %v79_v29 = vld [vmem:[%s2755_s0 + $0x1a] sm:$0xff] }
  0x46   :  { %1949 = vmatpush1.bf16.msra.mxu0 %v1948_v51  ;;  %v62_v51 = vld [vmem:[%s2755_s0 + $0x8] sm:$0xff]  ;;  %v2010_v23 = vpack.c.bf16 %v192_v21, %v190_v20 }
  0x47   :  { %1951 = vmatprep.subr.bf16.mxu0 %v1950_v52  ;;  %v1990_v52 = vpack.c.bf16 %v172_v49, %v170_v48  ;;  %v77_v27 = vld [vmem:[%s2755_s0 + $0x2] sm:$0xff]  ;;  %v78_v28 = vld [vmem:[%s2755_s0 + $0xa] sm:$0xff] }
  0x4a   :  { %1953 = vmatpush1.bf16.msra.mxu0 %v1952_v57  ;;  %v176_v57 = vld [vmem:[#allocation5 + $0x278] sm:$0xff] }
  0x4b   :  { %1955 = vmatprep.subr.bf16.mxu0 %v1954_v58  ;;  %v1992_v58 = vpack.c.bf16 %v171_v54, %v169_v53  ;;  %v1994_v60 = vpack.c.bf16 %v176_v57, %v174_v56 }
  0x4e   :  { %1957 = vmatpush1.bf16.msra.mxu0 %v1956_v63  ;;  %v72_v63 = vld [vmem:[%s2755_s0 + $0x21] sm:$0xff] }
  0x4f   :  { %1959 = vmatprep.subr.bf16.mxu0 %v1958_v1  ;;  %v178_v1 = vld [vmem:[#allocation5 + $0x288] sm:$0xff] }
  0x50   :  { %v1998_v5 = vpack.c.bf16 %v180_v2, %v178_v1 }
  0x52   :  { %1961 = vmatpush1.bf16.msra.mxu0 %v1960_v6  ;;  %v177_v6 = vld [vmem:[#allocation5 + $0x280] sm:$0xff] }
  0x53   :  { %1963 = vmatprep.subr.bf16.mxu0 %v1962_v7  ;;  %v179_v7 = vld [vmem:[#allocation5 + $0x290] sm:$0xff] }
  0x54   :  { %v2000_v10 = vpack.c.bf16 %v179_v7, %v177_v6 }
  0x56   :  { %1965 = vmatpush1.bf16.msra.mxu0 %v1964_v12  ;;  %v181_v12 = vld [vmem:[#allocation5 + $0x2a0] sm:$0xff] }
  0x57   :  { %1967 = vmatprep.subr.bf16.mxu0 %v1966_v13  ;;  %v183_v13 = vld [vmem:[#allocation5 + $0x2b0] sm:$0xff] }
  0x58   :  { %v2004_v16 = vpack.c.bf16 %v183_v13, %v181_v12 }
  0x5a   :  { %1969 = vmatpush1.bf16.msra.mxu0 %v1968_v18  ;;  %v185_v18 = vld [vmem:[#allocation5 + $0x2c0] sm:$0xff] }
  0x5b   :  { %1971 = vmatprep.subr.bf16.mxu0 %v1970_v19  ;;  %v187_v19 = vld [vmem:[#allocation5 + $0x2d0] sm:$0xff] }
  0x5c   :  { %v2008_v22 = vpack.c.bf16 %v187_v19, %v185_v18 }
  0x5e   :  { %1973 = vmatpush1.bf16.msra.mxu0 %v1972_v24  ;;  %v189_v24 = vld [vmem:[#allocation5 + $0x2e0] sm:$0xff] }
  0x5f   :  { %1975 = vmatprep.subr.bf16.mxu0 %v1974_v25  ;;  %v191_v25 = vld [vmem:[#allocation5 + $0x2f0] sm:$0xff] }
  0x60   :  { %v2012_v26 = vpack.c.bf16 %v191_v25, %v189_v24 }
  0x62   :  { %1977 = vmatpush1.bf16.msra.mxu0 %v1976_v30  ;;  %v80_v30 = vld [vmem:[%s2755_s0 + $0x22] sm:$0xff] }
  0x63   :  { %1979 = vmatprep.subr.bf16.mxu0 %v1978_v31  ;;  %v2452_v31 = vld [vmem:[%s2759_s4] sm:$0xff] }
  0x64   :  { %1899 = vmatpush3.xpose.msra.mxu1 %v2452_v31 }
  0x65   :  { %1903 = vmatprep.subr.mxu1 %v2325_v0 }
  0x66   :  { %1981 = vmatpush1.bf16.msra.mxu0 %v1980_v36 }
  0x67   :  { %1983 = vmatprep.subr.bf16.mxu0 %v1982_v37 }
  0x69   :  { %258 = vmatmul.mubr.f32.vlgmr.msra.gmra.mrb[0].mxu0 %v61_v42 }
  0x6a   :  { %1985 = vmatpush1.bf16.msra.mxu0 %v1984_v43  ;;  %263 = vmatprep.mubr.f32.mxu0 %v70_v47 }
  0x6b   :  { %1987 = vmatprep.subr.bf16.mxu0 %v1986_v44 }
  0x6d   :  { %264 = vmatmul.mubr.f32.gmra.mrb[2].mxu0 %v62_v51 }
  0x6e   :  { %1989 = vmatpush1.bf16.msra.mxu0 %v1988_v50  ;;  %269 = vmatprep.mubr.f32.mxu0 %v71_v55 }
  0x6f   :  { %1991 = vmatprep.subr.bf16.mxu0 %v1990_v52 }
  0x71   :  { %270 = vmatmul.mubr.f32.gmra.mrb[4].mxu0 %v63_v59 }
  0x72   :  { %1993 = vmatpush1.bf16.msra.mxu0 %v1992_v58  ;;  %275 = vmatprep.mubr.f32.mxu0 %v72_v63 }
  0x73   :  { %1995 = vmatprep.subr.bf16.mxu0 %v1994_v60 }
  0x75   :  { %276 = vmatmul.mubr.f32.gmra.mrb[6].mxu0 %v64_v4 }
  0x76   :  { %1997 = vmatpush1.bf16.msra.mxu0 %v1996_v3  ;;  %346 = vmatprep.mubr.f32.mxu0 %v2325_v0 }
  0x77   :  { %1999 = vmatprep.subr.bf16.mxu0 %v1998_v5 }
  0x7a   :  { %2001 = vmatpush1.bf16.msra.mxu0 %v2000_v10 }
  0x7b   :  { %2003 = vmatprep.subr.bf16.mxu0 %v2002_v11 }
  0x7e   :  { %2005 = vmatpush1.bf16.msra.mxu0 %v2004_v16 }
  0x7f   :  { %2007 = vmatprep.subr.bf16.mxu0 %v2006_v17 }
  0x82   :  { %2009 = vmatpush1.bf16.msra.mxu0 %v2008_v22 }
  0x83   :  { %2011 = vmatprep.subr.bf16.mxu0 %v2010_v23 }
  0x86   :  { %2013 = vmatpush1.bf16.msra.mxu0 %v2012_v26 }
  0x89   :  { %347 = vmatmul.mubr.f32.vlgmr.msra.gmra.mrb[0].mxu0 %v77_v27 }
  0x8a   :  { %352 = vmatprep.mubr.f32.mxu0 %v2325_v0 }
  0x8d   :  { %353 = vmatmul.mubr.f32.gmra.mrb[2].mxu0 %v78_v28 }
  0x8e   :  { %358 = vmatprep.mubr.f32.mxu0 %v2325_v0 }
  0x91   :  { %359 = vmatmul.mubr.f32.gmra.mrb[4].mxu0 %v79_v29 }
  0x92   :  { %364 = vmatprep.mubr.f32.mxu0 %v2325_v0 }
  0x95   :  { %365 = vmatmul.mubr.f32.gmra.mrb[6].mxu0 %v80_v30 }
 0x15c   :  { %v2458_v32 = vpop.f32.mrb[0].mxu0 }
 0x15d   :  { %v2460_v33 = vpop.f32.mrb[1].mxu0  ;;  %v392_v36 = vmul.f32 %v2458_v32, %v2458_v32 }
 0x15e   :  { %v418_v34 = vmul.f32 %v2460_v33, %v2458_v32  ;;  %v405_v40 = vmul.f32 %v2460_v33, %v2460_v33 }
 0x160   :  { %v2464_v35 = vpop.f32.mrb[2].mxu0 }
 0x161   :  { %v374_v37 = vadd.f32 %v2464_v35, %v2458_v32  ;;  %v393_v38 = vmul.f32 %v2464_v35, %v2464_v35  ;;  %v2472_v39 = vpop.f32.mrb[3].mxu0 }
 0x162   :  { %v383_v41 = vadd.f32 %v2472_v39, %v2460_v33  ;;  %v406_v42 = vmul.f32 %v2472_v39, %v2472_v39  ;;  %v419_v43 = vmul.f32 %v2472_v39, %v2464_v35 }
 0x163   :  { %v396_v44 = vadd.f32 %v393_v38, %v392_v36 }
 0x164   :  { %v409_v45 = vadd.f32 %v406_v42, %v405_v40  ;;  %v422_v46 = vadd.f32 %v419_v43, %v418_v34  ;;  %v2482_v47 = vpop.f32.mrb[4].mxu0  ;;  %v998_v43 = vld [vmem:[#allocation8 + $0x8] sm:$0xff] }
 0x165   :  { %v375_v48 = vadd.f32 %v374_v37, %v2482_v47  ;;  %v394_v49 = vmul.f32 %v2482_v47, %v2482_v47  ;;  %v2487_v50 = vpop.f32.mrb[5].mxu0 }
 0x166   :  { %v384_v51 = vadd.f32 %v383_v41, %v2487_v50  ;;  %v407_v52 = vmul.f32 %v2487_v50, %v2487_v50  ;;  %v420_v53 = vmul.f32 %v2487_v50, %v2482_v47 }
 0x167   :  { %v397_v54 = vadd.f32 %v396_v44, %v394_v49  ;;  %v1000_v44 = vld [vmem:[#allocation8 + $0x18] sm:$0xff]  ;;  %v1062_v49 = vld [vmem:[#allocation8 + $0x208] sm:$0xff] }
 0x168   :  { %v410_v55 = vadd.f32 %v409_v45, %v407_v52  ;;  %v423_v56 = vadd.f32 %v422_v46, %v420_v53  ;;  %v2494_v57 = vpop.f32.mrb[6].mxu0  ;;  %v997_v45 = vld [vmem:[#allocation8] sm:$0xff]  ;;  %v2014_v46 = vpack.c.bf16 %v1000_v44, %v998_v43  ;;  %v1031_v43 = vld [vmem:[#allocation8 + $0x110] sm:$0xff]  ;;  %v1034_v44 = vld [vmem:[#allocation8 + $0x128] sm:$0xff] }
 0x169   :  { %v376_v58 = vadd.f32 %v375_v48, %v2494_v57  ;;  %v395_v59 = vmul.f32 %v2494_v57, %v2494_v57  ;;  %v2499_v60 = vpop.f32.mrb[7].mxu0  ;;  %v999_v48 = vld [vmem:[#allocation8 + $0x10] sm:$0xff] }
 0x16a   :  { %v385_v61 = vadd.f32 %v384_v51, %v2499_v60  ;;  %v408_v62 = vmul.f32 %v2499_v60, %v2499_v60  ;;  %v421_v63 = vmul.f32 %v2499_v60, %v2494_v57  ;;  %v1064_v51 = vld [vmem:[#allocation8 + $0x218] sm:$0xff]  ;;  %v2016_v52 = vpack.c.bf16 %v999_v48, %v997_v45  ;;  %2015 = vmatprep.subr.bf16.mxu0 %v2014_v46 }
 0x16b   :  { %v377_v1 = vrot.slane %v376_v58, 4  ;;  %v398_v2 = vadd.f32 %v397_v54, %v395_v59  ;;  %v2078_v53 = vpack.c.bf16 %v1064_v51, %v1062_v49  ;;  %v1002_v54 = vld [vmem:[#allocation8 + $0x28] sm:$0xff]  ;;  %v1003_v59 = vld [vmem:[#allocation8 + $0x30] sm:$0xff]  ;;  %v1036_v45 = vld [vmem:[#allocation8 + $0x138] sm:$0xff] }
 0x16c   :  { %v386_v3 = vrot.slane %v385_v61, 4  ;;  %v411_v4 = vadd.f32 %v410_v55, %v408_v62  ;;  %v424_v5 = vadd.f32 %v423_v56, %v421_v63  ;;  %v1004_v55 = vld [vmem:[#allocation8 + $0x38] sm:$0xff]  ;;  %2017 = vmatpush1.bf16.msra.mxu0 %v2016_v52  ;;  %v2050_v48 = vpack.c.bf16 %v1036_v45, %v1034_v44  ;;  %v1033_v49 = vld [vmem:[#allocation8 + $0x120] sm:$0xff]  ;;  %v1035_v51 = vld [vmem:[#allocation8 + $0x130] sm:$0xff] }
 0x16d   :  { %v378_v6 = vadd.f32 %v377_v1, %v376_v58  ;;  %v399_v7 = vrot.slane %v398_v2, 4  ;;  %v2018_v56 = vpack.c.bf16 %v1004_v55, %v1002_v54  ;;  %v1001_v58 = vld [vmem:[#allocation8 + $0x20] sm:$0xff]  ;;  %v1008_v62 = vld [vmem:[#allocation8 + $0x58] sm:$0xff]  ;;  %v1038_v52 = vld [vmem:[#allocation8 + $0x148] sm:$0xff]  ;;  %v2052_v54 = vpack.c.bf16 %v1035_v51, %v1033_v49 }
 0x16e   :  { %v387_v8 = vadd.f32 %v386_v3, %v385_v61  ;;  %v412_v9 = vrot.slane %v411_v4, 4  ;;  %v425_v10 = vrot.slane %v424_v5, 4  ;;  %v1006_v61 = vld [vmem:[#allocation8 + $0x48] sm:$0xff]  ;;  %v1005_v1 = vld [vmem:[#allocation8 + $0x40] sm:$0xff] }
 0x16f   :  { %v379_v11 = vrot.slane %v378_v6, 2  ;;  %v400_v12 = vadd.f32 %v399_v7, %v398_v2  ;;  %2019 = vmatprep.subr.bf16.mxu0 %v2018_v56  ;;  %v2022_v63 = vpack.c.bf16 %v1008_v62, %v1006_v61  ;;  %v1007_v2 = vld [vmem:[#allocation8 + $0x50] sm:$0xff]  ;;  %v1010_v3 = vld [vmem:[#allocation8 + $0x68] sm:$0xff]  ;;  %v1009_v7 = vld [vmem:[#allocation8 + $0x60] sm:$0xff] }
 0x170   :  { %v388_v13 = vrot.slane %v387_v8, 2  ;;  %v413_v14 = vadd.f32 %v412_v9, %v411_v4  ;;  %v426_v15 = vadd.f32 %v425_v10, %v424_v5  ;;  %v1012_v4 = vld [vmem:[#allocation8 + $0x78] sm:$0xff]  ;;  %v2024_v5 = vpack.c.bf16 %v1007_v2, %v1005_v1  ;;  %v1014_v9 = vld [vmem:[#allocation8 + $0x88] sm:$0xff]  ;;  %v1037_v56 = vld [vmem:[#allocation8 + $0x140] sm:$0xff] }
 0x171   :  { %v380_v16 = vadd.f32 %v379_v11, %v378_v6  ;;  %v401_v17 = vrot.slane %v400_v12, 2  ;;  %v2026_v6 = vpack.c.bf16 %v1012_v4, %v1010_v3  ;;  %v1016_v10 = vld [vmem:[#allocation8 + $0x98] sm:$0xff] }
 0x172   :  { %v389_v18 = vadd.f32 %v388_v13, %v387_v8  ;;  %v414_v19 = vrot.slane %v413_v14, 2  ;;  %v427_v20 = vrot.slane %v426_v15, 2  ;;  %v1011_v8 = vld [vmem:[#allocation8 + $0x70] sm:$0xff]  ;;  %v1013_v13 = vld [vmem:[#allocation8 + $0x80] sm:$0xff] }
 0x173   :  { %v381_v21 = vrot.slane %v380_v16, 1  ;;  %v402_v22 = vadd.f32 %v401_v17, %v400_v12  ;;  %v2028_v11 = vpack.c.bf16 %v1011_v8, %v1009_v7  ;;  %v2030_v12 = vpack.c.bf16 %v1016_v10, %v1014_v9 }
 0x174   :  { %v390_v23 = vrot.slane %v389_v18, 1  ;;  %v415_v24 = vadd.f32 %v414_v19, %v413_v14  ;;  %v428_v25 = vadd.f32 %v427_v20, %v426_v15  ;;  %v1015_v14 = vld [vmem:[#allocation8 + $0x90] sm:$0xff]  ;;  %v1018_v15 = vld [vmem:[#allocation8 + $0xa8] sm:$0xff]  ;;  %v1017_v19 = vld [vmem:[#allocation8 + $0xa0] sm:$0xff] }
 0x175   :  { %v382_v26 = vadd.f32 %v381_v21, %v380_v16  ;;  %v403_v27 = vrot.slane %v402_v22, 1  ;;  %v1020_v16 = vld [vmem:[#allocation8 + $0xb8] sm:$0xff]  ;;  %v2032_v17 = vpack.c.bf16 %v1015_v14, %v1013_v13  ;;  %v1019_v20 = vld [vmem:[#allocation8 + $0xb0] sm:$0xff]  ;;  %v1022_v21 = vld [vmem:[#allocation8 + $0xc8] sm:$0xff] }
 0x176   :  { %v391_v28 = vadd.f32 %v390_v23, %v389_v18  ;;  %v416_v29 = vrot.slane %v415_v24, 1  ;;  %v429_v30 = vrot.slane %v428_v25, 1  ;;  %v2034_v18 = vpack.c.bf16 %v1020_v16, %v1018_v15 }
 0x177   :  { %v404_v34 = vadd.f32 %v403_v27, %v402_v22  ;;  %v1024_v22 = vld [vmem:[#allocation8 + $0xd8] sm:$0xff]  ;;  %v2036_v23 = vpack.c.bf16 %v1019_v20, %v1017_v19  ;;  %v1026_v27 = vld [vmem:[#allocation8 + $0xe8] sm:$0xff] }
 0x178   :  { %v417_v36 = vadd.f32 %v416_v29, %v415_v24  ;;  %v430_v37 = vadd.f32 %v429_v30, %v428_v25  ;;  %v432_v38 = vsel %vm431_vm1, %v382_v26, %v391_v28  ;;  %v2038_v24 = vpack.c.bf16 %v1024_v22, %v1022_v21  ;;  %v1021_v25 = vld [vmem:[#allocation8 + $0xc0] sm:$0xff]  ;;  %v1023_v26 = vld [vmem:[#allocation8 + $0xd0] sm:$0xff]  ;;  %v1028_v28 = vld [vmem:[#allocation8 + $0xf8] sm:$0xff] }
 0x179   :  { %v434_v40 = vsel %vm433_vm2, %v432_v38, %v404_v34  ;;  %v2040_v29 = vpack.c.bf16 %v1023_v26, %v1021_v25  ;;  %v2042_v30 = vpack.c.bf16 %v1028_v28, %v1026_v27  ;;  %v1025_v34 = vld [vmem:[#allocation8 + $0xe0] sm:$0xff]  ;;  %v1032_v38 = vld [vmem:[#allocation8 + $0x118] sm:$0xff] }
 0x17a   :  { %v436_v41 = vsel %vm435_vm3, %v434_v40, %v417_v36  ;;  %v1027_v36 = vld [vmem:[#allocation8 + $0xf0] sm:$0xff] }
 0x17b   :  { %v438_v42 = vsel %vm437_vm4, %v436_v41, %v430_v37  ;;  %v1030_v37 = vld [vmem:[#allocation8 + $0x108] sm:$0xff]  ;;  %v2044_v40 = vpack.c.bf16 %v1027_v36, %v1025_v34 }
 0x17c   :  { %1901 = vmatmul.mubr.f32.vlgmr.msra.gmra.mrb[0].mxu1 %v438_v42  ;;  %v2046_v41 = vpack.c.bf16 %v1032_v38, %v1030_v37  ;;  %v1029_v42 = vld [vmem:[#allocation8 + $0x100] sm:$0xff] }
 0x17d   :  { %1904 = vmatpush3.msra.mxu1 %v2452_v31  ;;  %1905 = vmatprep.mubr.msk.f32.mxu1 %vm2326_vm0, %v2325_v0  ;;  %v2020_v31 = vpack.c.bf16 %v1003_v59, %v1001_v58  ;;  %v2048_v46 = vpack.c.bf16 %v1031_v43, %v1029_v42  ;;  %v1039_v58 = vld [vmem:[#allocation8 + $0x150] sm:$0xff] }
 0x17e   :  { %2079 = vmatprep.subr.bf16.mxu1 %v2078_v53  ;;  %v1040_v53 = vld [vmem:[#allocation8 + $0x158] sm:$0xff] }
 0x17f   :  { %2021 = vmatpush1.bf16.msra.mxu0 %v2020_v31  ;;  %v2054_v55 = vpack.c.bf16 %v1040_v53, %v1038_v52  ;;  %v2056_v31 = vpack.c.bf16 %v1039_v58, %v1037_v56 }
 0x180   :  { %2023 = vmatprep.subr.bf16.mxu0 %v2022_v63 }
 0x183   :  { %2025 = vmatpush1.bf16.msra.mxu0 %v2024_v5 }
 0x184   :  { %2027 = vmatprep.subr.bf16.mxu0 %v2026_v6 }
 0x187   :  { %2029 = vmatpush1.bf16.msra.mxu0 %v2028_v11 }
 0x188   :  { %2031 = vmatprep.subr.bf16.mxu0 %v2030_v12 }
 0x18b   :  { %2033 = vmatpush1.bf16.msra.mxu0 %v2032_v17 }
 0x18c   :  { %2035 = vmatprep.subr.bf16.mxu0 %v2034_v18 }
 0x18f   :  { %2037 = vmatpush1.bf16.msra.mxu0 %v2036_v23 }
 0x190   :  { %2039 = vmatprep.subr.bf16.mxu0 %v2038_v24 }
 0x193   :  { %2041 = vmatpush1.bf16.msra.mxu0 %v2040_v29 }
 0x194   :  { %2043 = vmatprep.subr.bf16.mxu0 %v2042_v30 }
 0x197   :  { %2045 = vmatpush1.bf16.msra.mxu0 %v2044_v40  ;;  %v371_v40 = vld [vmem:[%s2757_s2] sm:$0xf] }
 0x198   :  { %2047 = vmatprep.subr.bf16.mxu0 %v2046_v41 }
 0x19b   :  { %2049 = vmatpush1.bf16.msra.mxu0 %v2048_v46 }
 0x19c   :  { %2051 = vmatprep.subr.bf16.mxu0 %v2050_v48 }
 0x19f   :  { %2053 = vmatpush1.bf16.msra.mxu0 %v2052_v54 }
 0x1a0   :  { %2055 = vmatprep.subr.bf16.mxu0 %v2054_v55 }
 0x1a3   :  { %2057 = vmatpush1.bf16.msra.mxu0 %v2056_v31 }
 0x24f   :  { %v505_v59 = vpop.f32.mrb[0].mxu1 }
 0x250   :  { %v2513_v61 = vmul.f32 0.001953125, %v505_v59  ;;  %v1902_v62 = vpop.f32.mrb[1].mxu1 }
 0x252   :  { %v510_v63 = vmul.f32 %v2513_v61, %v2513_v61  ;;  %v517_v1 = vrot.slane %v2513_v61, 1 }
 0x254   :  { %v512_v2 = vrot.slane %v510_v63, 6  ;;  %v519_v3 = vmul.f32 %v517_v1, %v2513_v61 }
 0x256   :  { %v514_v4 = vsub.f32 %v2513_v61, %v512_v2  ;;  %v521_v5 = vrot.slane %v519_v3, 4 }
 0x258   :  { %v515_v6 = vadd.f32 1e-05, %v514_v4  ;;  %v523_v7 = vsub.f32 %v2513_v61, %v521_v5 }
 0x25a   :  { %v525_v8 = vrot.slane %v515_v6, 1  ;;  %v528_v9 = vmul.f32 %v523_v7, %v523_v7  ;;  %v562_v30 = vsub.f32 0.0, %v523_v7 }
 0x25c   :  { %v527_v10 = vmul.f32 %v525_v8, %v515_v6  ;;  %v530_v11 = vrot.slane %v528_v9, 2  ;;  %v540_v18 = vadd.f32 %v525_v8, %v515_v6  ;;  %v372_v9 = vld [vmem:[%s2758_s3] sm:$0x3] }
 0x25e   :  { %v532_v12 = vsub.f32 %v527_v10, %v530_v11  ;;  %v613_v11 = vrot.slane %v2513_v61, 6 }
 0x260   :  { %2237 = vrsqrt.f32 %v532_v12  ;;  %vm535_vm5 = vcmp.eq.f32.partialorder %v532_v12, inf  ;;  %v538_v15 = vand.u32 2147483648, %v532_v12  ;;  %vm537_vm6 = vcmp.eq.f32.partialorder %v532_v12, 0.0 }
 0x26a   :  { %v2238_v13 = vpop.eup %2237 }
 0x26b   :  { %v534_v14 = vmul.f32 %v2238_v13, %v532_v12 }
 0x26d   :  { %v536_v16 = vsel %vm535_vm5, %v532_v12, %v534_v14  ;;  %v620_v12 = vrot.slane %v2513_v61, 7 }
 0x26e   :  { %v539_v17 = vsel %vm537_vm6, %v538_v15, %v536_v16 }
 0x26f   :  { %v541_v19 = vmul.f32 2.0, %v539_v17  ;;  %v553_v27 = vrot.slane %v539_v17, 7  ;;  %v560_v28 = vadd.f32 %v539_v17, %v515_v6 }
 0x271   :  { %v542_v20 = vadd.f32 %v541_v19, %v540_v18  ;;  %v555_v34 = vadd.f32 %v553_v27, %v515_v6  ;;  %v1063_v27 = vld [vmem:[#allocation8 + $0x210] sm:$0xff] }
 0x273   :  { %2239 = vrsqrt.f32 %v542_v20  ;;  %vm545_vm7 = vcmp.eq.f32.partialorder %v542_v20, inf  ;;  %v548_v23 = vand.u32 2147483648, %v542_v20  ;;  %vm547_vm8 = vcmp.eq.f32.partialorder %v542_v20, 0.0 }
 0x27d   :  { %v2240_v21 = vpop.eup %2239 }
 0x27e   :  { %v544_v22 = vmul.f32 %v2240_v21, %v542_v20 }
 0x280   :  { %v546_v24 = vsel %vm545_vm7, %v542_v20, %v544_v22 }
 0x281   :  { %v549_v25 = vsel %vm547_vm8, %v548_v23, %v546_v24 }
 0x282   :  { %v550_v26 = vmul.f32 %v549_v25, %v539_v17 }
 0x284   :  { %2241 = vrcp.f32 %v550_v26  ;;  %v1061_v26 = vld [vmem:[#allocation8 + $0x200] sm:$0xff] }
 0x28e   :  { %v2242_v29 = vpop.eup %2241 }
 0x28f   :  { %v557_v36 = vrot.slane %v2242_v29, 7  ;;  %v561_v37 = vmul.f32 %v2242_v29, %v560_v28  ;;  %v563_v38 = vrot.slane %v2242_v29, 6 }
 0x291   :  { %v559_v41 = vmul.f32 %v557_v36, %v555_v34  ;;  %v565_v42 = vmul.f32 %v563_v38, %v562_v30  ;;  %v582_v43 = vrot.slane %v561_v37, 1  ;;  %v602_v44 = vrot.slane %v561_v37, 7  ;;  %v1066_v30 = vld [vmem:[#allocation8 + $0x228] sm:$0xff]  ;;  %v1068_v34 = vld [vmem:[#allocation8 + $0x238] sm:$0xff]  ;;  %v1065_v38 = vld [vmem:[#allocation8 + $0x220] sm:$0xff] }
 0x292   :  { %v2082_v37 = vpack.c.bf16 %v1068_v34, %v1066_v30  ;;  %v1097_v30 = vld [vmem:[#allocation8 + $0x320] sm:$0xff]  ;;  %v1099_v34 = vld [vmem:[#allocation8 + $0x330] sm:$0xff] }
 0x293   :  { %v567_v45 = vrot.slane %v559_v41, 3  ;;  %v571_v46 = vrot.slane %v565_v42, 3  ;;  %v578_v48 = vrot.slane %v565_v42, 4  ;;  %v584_v49 = vmul.f32 %v582_v43, %v371_v40  ;;  %v1072_v43 = vld [vmem:[#allocation8 + $0x258] sm:$0xff] }
 0x294   :  { %v589_v51 = vrot.slane %v559_v41, 1  ;;  %v592_v52 = vrot.slane %v565_v42, 1  ;;  %v599_v53 = vrot.slane %v565_v42, 2  ;;  %v604_v54 = vmul.f32 %v602_v44, %v371_v40  ;;  %v1070_v42 = vld [vmem:[#allocation8 + $0x248] sm:$0xff] }
 0x295   :  { %v573_v55 = vmul.f32 %v571_v46, %v371_v40  ;;  %v580_v56 = vmul.f32 %v578_v48, %v371_v40  ;;  %v586_v58 = vrot.slane %v584_v49, 1  ;;  %v569_v63 = vmul.f32 %v567_v45, %v371_v40  ;;  %v1069_v46 = vld [vmem:[#allocation8 + $0x240] sm:$0xff]  ;;  %v1071_v48 = vld [vmem:[#allocation8 + $0x250] sm:$0xff]  ;;  %v1074_v49 = vld [vmem:[#allocation8 + $0x268] sm:$0xff] }
 0x296   :  { %v594_v59 = vmul.f32 %v592_v52, %v371_v40  ;;  %v601_v31 = vmul.f32 %v599_v53, %v371_v40  ;;  %v606_v62 = vrot.slane %v604_v54, 1  ;;  %v591_v4 = vmul.f32 %v589_v51, %v371_v40  ;;  %v1067_v40 = vld [vmem:[#allocation8 + $0x230] sm:$0xff]  ;;  %v1076_v51 = vld [vmem:[#allocation8 + $0x278] sm:$0xff]  ;;  %v1073_v54 = vld [vmem:[#allocation8 + $0x260] sm:$0xff] }
 0x297   :  { %v575_v2 = vrot.slane %v573_v55, 1  ;;  %v588_v3 = vadd.f32 %v586_v58, %v580_v56  ;;  %v2084_v44 = vpack.c.bf16 %v1067_v40, %v1065_v38  ;;  %v2086_v45 = vpack.c.bf16 %v1072_v43, %v1070_v42  ;;  %v1075_v55 = vld [vmem:[#allocation8 + $0x270] sm:$0xff]  ;;  %v1078_v56 = vld [vmem:[#allocation8 + $0x288] sm:$0xff]  ;;  %v1080_v58 = vld [vmem:[#allocation8 + $0x298] sm:$0xff] }
 0x298   :  { %v596_v5 = vrot.slane %v594_v59, 1  ;;  %v608_v6 = vadd.f32 %v606_v62, %v601_v31  ;;  %v2088_v52 = vpack.c.bf16 %v1071_v48, %v1069_v46  ;;  %v2090_v53 = vpack.c.bf16 %v1076_v51, %v1074_v49  ;;  %v1077_v62 = vld [vmem:[#allocation8 + $0x280] sm:$0xff]  ;;  %v1103_v40 = vld [vmem:[#allocation8 + $0x350] sm:$0xff]  ;;  %v1044_v42 = vld [vmem:[#allocation8 + $0x178] sm:$0xff] }
 0x299   :  { %v577_v7 = vadd.f32 %v575_v2, %v569_v63  ;;  %v628_v8 = vrot.slane %v588_v3, 7  ;;  %v611_v18 = vmul.f32 %v588_v3, %v517_v1  ;;  %v2080_v1 = vpack.c.bf16 %v1063_v27, %v1061_v26  ;;  %v1079_v63 = vld [vmem:[#allocation8 + $0x290] sm:$0xff]  ;;  %v1082_v2 = vld [vmem:[#allocation8 + $0x2a8] sm:$0xff]  ;;  %v1084_v3 = vld [vmem:[#allocation8 + $0x2b8] sm:$0xff] }
 0x29a   :  { %v598_v10 = vadd.f32 %v596_v5, %v591_v4  ;;  %v622_v15 = vmul.f32 %v620_v12, %v608_v6  ;;  %v631_v24 = vrot.slane %v608_v6, 7  ;;  %v2092_v59 = vpack.c.bf16 %v1075_v55, %v1073_v54  ;;  %v1081_v6 = vld [vmem:[#allocation8 + $0x2a0] sm:$0xff]  ;;  %v1098_v26 = vld [vmem:[#allocation8 + $0x328] sm:$0xff]  ;;  %v1100_v27 = vld [vmem:[#allocation8 + $0x338] sm:$0xff] }
 0x29b   :  { %v609_v13 = vmul.f32 %v577_v7, %v2513_v61  ;;  %v639_v16 = vsel %vm431_vm1, %v577_v7, %v628_v8  ;;  %v2094_v31 = vpack.c.bf16 %v1080_v58, %v1078_v56  ;;  %v2096_v4 = vpack.c.bf16 %v1079_v63, %v1077_v62  ;;  %v1083_v7 = vld [vmem:[#allocation8 + $0x2b0] sm:$0xff]  ;;  %v1086_v8 = vld [vmem:[#allocation8 + $0x2c8] sm:$0xff]  ;;  %v1085_v12 = vld [vmem:[#allocation8 + $0x2c0] sm:$0xff] }
 0x29c   :  { %v615_v14 = vmul.f32 %v613_v11, %v598_v10  ;;  %v640_v21 = vsel %vm433_vm2, %v639_v16, %v598_v10  ;;  %v624_v23 = vrot.slane %v622_v15, 1  ;;  %v2098_v5 = vpack.c.bf16 %v1084_v3, %v1082_v2  ;;  %v1092_v15 = vld [vmem:[#allocation8 + $0x2f8] sm:$0xff]  ;;  %v1101_v38 = vld [vmem:[#allocation8 + $0x340] sm:$0xff]  ;;  %v1043_v46 = vld [vmem:[#allocation8 + $0x170] sm:$0xff] }
 0x29d   :  { %v610_v17 = vsub.f32 %v372_v9, %v609_v13  ;;  %v641_v29 = vsel %vm435_vm3, %v640_v21, %v631_v24  ;;  %v2100_v10 = vpack.c.bf16 %v1083_v7, %v1081_v6  ;;  %v1087_v13 = vld [vmem:[#allocation8 + $0x2d0] sm:$0xff]  ;;  %v1096_v21 = vld [vmem:[#allocation8 + $0x318] sm:$0xff]  ;;  %v1093_v24 = vld [vmem:[#allocation8 + $0x300] sm:$0xff]  ;;  %v2120_v43 = vpack.c.bf16 %v1103_v40, %v1101_v38 }
 0x29e   :  { %v617_v19 = vrot.slane %v615_v14, 1  ;;  %v1090_v14 = vld [vmem:[#allocation8 + $0x2e8] sm:$0xff]  ;;  %v2104_v16 = vpack.c.bf16 %v1087_v13, %v1085_v12  ;;  %v1108_v51 = vld [vmem:[#allocation8 + $0x378] sm:$0xff]  ;;  %v1107_v54 = vld [vmem:[#allocation8 + $0x370] sm:$0xff] }
 0x29f   :  { %v612_v20 = vsub.f32 %v610_v17, %v611_v18  ;;  %v2106_v17 = vpack.c.bf16 %v1092_v15, %v1090_v14  ;;  %v1089_v18 = vld [vmem:[#allocation8 + $0x2e0] sm:$0xff]  ;;  %v1106_v49 = vld [vmem:[#allocation8 + $0x368] sm:$0xff]  ;;  %v1048_v56 = vld [vmem:[#allocation8 + $0x198] sm:$0xff] }
 0x2a0   :  { %v619_v22 = vsub.f32 %v372_v9, %v617_v19  ;;  %v1088_v9 = vld [vmem:[#allocation8 + $0x2d8] sm:$0xff]  ;;  %v1091_v19 = vld [vmem:[#allocation8 + $0x2f0] sm:$0xff]  ;;  %v1046_v55 = vld [vmem:[#allocation8 + $0x188] sm:$0xff] }
 0x2a1   :  { %v634_v25 = vrot.slane %v612_v20, 4  ;;  %v2102_v11 = vpack.c.bf16 %v1088_v9, %v1086_v8  ;;  %v1094_v20 = vld [vmem:[#allocation8 + $0x308] sm:$0xff]  ;;  %v1047_v62 = vld [vmem:[#allocation8 + $0x190] sm:$0xff]  ;;  %v1112_v3 = vld [vmem:[#allocation8 + $0x398] sm:$0xff] }
 0x2a2   :  { %v626_v28 = vsub.f32 %v619_v22, %v624_v23  ;;  %v2108_v22 = vpack.c.bf16 %v1091_v19, %v1089_v18  ;;  %v2110_v23 = vpack.c.bf16 %v1096_v21, %v1094_v20  ;;  %v1110_v2 = vld [vmem:[#allocation8 + $0x388] sm:$0xff]  ;;  %v1111_v6 = vld [vmem:[#allocation8 + $0x390] sm:$0xff]  ;;  %v1052_v8 = vld [vmem:[#allocation8 + $0x1b8] sm:$0xff] }
 0x2a3   :  { %v642_v36 = vsel %vm437_vm4, %v641_v29, %v634_v25  ;;  %v1095_v25 = vld [vmem:[#allocation8 + $0x310] sm:$0xff]  ;;  %v2114_v29 = vpack.c.bf16 %v1100_v27, %v1098_v26  ;;  %v1050_v7 = vld [vmem:[#allocation8 + $0x1a8] sm:$0xff]  ;;  %v1116_v15 = vld [vmem:[#allocation8 + $0x3b8] sm:$0xff] }
 0x2a4   :  { %v637_v61 = vrot.slane %v626_v28, 4  ;;  %v2112_v28 = vpack.c.bf16 %v1095_v25, %v1093_v24  ;;  %v1051_v12 = vld [vmem:[#allocation8 + $0x1b0] sm:$0xff]  ;;  %v1114_v14 = vld [vmem:[#allocation8 + $0x3a8] sm:$0xff]  ;;  %v1056_v20 = vld [vmem:[#allocation8 + $0x1d8] sm:$0xff] }
 0x2a5   :  { %v1115_v18 = vld [vmem:[#allocation8 + $0x3b0] sm:$0xff]  ;;  %v1054_v19 = vld [vmem:[#allocation8 + $0x1c8] sm:$0xff]  ;;  %v1120_v27 = vld [vmem:[#allocation8 + $0x3d8] sm:$0xff] }
 0x2a6   :  { %v644_v41 = vsel %vm643_vm9, %v642_v36, %v637_v61  ;;  %v2116_v36 = vpack.c.bf16 %v1099_v34, %v1097_v30  ;;  %v1102_v61 = vld [vmem:[#allocation8 + $0x348] sm:$0xff]  ;;  %v1055_v24 = vld [vmem:[#allocation8 + $0x1d0] sm:$0xff]  ;;  %v1060_v30 = vld [vmem:[#allocation8 + $0x1f8] sm:$0xff] }
 0x2a7   :  { %1906 = vmatmul.mubr.msk.f32.vlgmr.msra.gmra.mrb[2].mxu1 %vm645_vm10, %v644_v41  ;;  %v1042_v41 = vld [vmem:[#allocation8 + $0x168] sm:$0xff]  ;;  %v1117_v34 = vld [vmem:[#allocation8 + $0x3c0] sm:$0xff] }
 0x2a8   :  { %2081 = vmatpush1.bf16.msra.mxu1 %v2080_v1  ;;  %v1104_v1 = vld [vmem:[#allocation8 + $0x358] sm:$0xff]  ;;  %v1118_v26 = vld [vmem:[#allocation8 + $0x3c8] sm:$0xff] }
 0x2a9   :  { %2083 = vmatprep.subr.bf16.mxu1 %v2082_v37  ;;  %v2118_v37 = vpack.c.bf16 %v1104_v1, %v1102_v61  ;;  %v1119_v61 = vld [vmem:[#allocation8 + $0x3d0] sm:$0xff]  ;;  %v1057_v1 = vld [vmem:[#allocation8 + $0x1e0] sm:$0xff] }
 0x2aa   :  { %v2136_v38 = vpack.c.bf16 %v1119_v61, %v1117_v34 }
 0x2ac   :  { %2085 = vmatpush1.bf16.msra.mxu1 %v2084_v44  ;;  %v2058_v44 = vpack.c.bf16 %v1044_v42, %v1042_v41  ;;  %v1122_v41 = vld [vmem:[#allocation8 + $0x3e8] sm:$0xff]  ;;  %v1124_v42 = vld [vmem:[#allocation8 + $0x3f8] sm:$0xff] }
 0x2ad   :  { %2087 = vmatprep.subr.bf16.mxu1 %v2086_v45  ;;  %v1041_v45 = vld [vmem:[#allocation8 + $0x160] sm:$0xff] }
 0x2ae   :  { %v2060_v48 = vpack.c.bf16 %v1043_v46, %v1041_v45  ;;  %2059 = vmatprep.subr.bf16.mxu0 %v2058_v44  ;;  %v1121_v44 = vld [vmem:[#allocation8 + $0x3e0] sm:$0xff]  ;;  %v1123_v45 = vld [vmem:[#allocation8 + $0x3f0] sm:$0xff] }
 0x2af   :  { %v2140_v46 = vpack.c.bf16 %v1123_v45, %v1121_v44 }
 0x2b0   :  { %2089 = vmatpush1.bf16.msra.mxu1 %v2088_v52  ;;  %v2122_v52 = vpack.c.bf16 %v1108_v51, %v1106_v49  ;;  %2061 = vmatpush1.bf16.msra.mxu0 %v2060_v48  ;;  %v1126_v48 = vld [vmem:[#allocation8 + $0x408] sm:$0xff]  ;;  %v1128_v49 = vld [vmem:[#allocation8 + $0x418] sm:$0xff] }
 0x2b1   :  { %2091 = vmatprep.subr.bf16.mxu1 %v2090_v53  ;;  %v1105_v53 = vld [vmem:[#allocation8 + $0x360] sm:$0xff]  ;;  %v2142_v51 = vpack.c.bf16 %v1128_v49, %v1126_v48 }
 0x2b2   :  { %v2124_v58 = vpack.c.bf16 %v1107_v54, %v1105_v53 }
 0x2b4   :  { %2093 = vmatpush1.bf16.msra.mxu1 %v2092_v59  ;;  %v2062_v59 = vpack.c.bf16 %v1048_v56, %v1046_v55 }
 0x2b5   :  { %2095 = vmatprep.subr.bf16.mxu1 %v2094_v31  ;;  %v1045_v31 = vld [vmem:[#allocation8 + $0x180] sm:$0xff] }
 0x2b6   :  { %v2064_v63 = vpack.c.bf16 %v1047_v62, %v1045_v31  ;;  %2063 = vmatprep.subr.bf16.mxu0 %v2062_v59 }
 0x2b8   :  { %2097 = vmatpush1.bf16.msra.mxu1 %v2096_v4  ;;  %v2126_v4 = vpack.c.bf16 %v1112_v3, %v1110_v2  ;;  %2065 = vmatpush1.bf16.msra.mxu0 %v2064_v63 }
 0x2b9   :  { %2099 = vmatprep.subr.bf16.mxu1 %v2098_v5  ;;  %v1109_v5 = vld [vmem:[#allocation8 + $0x380] sm:$0xff] }
 0x2ba   :  { %v2128_v9 = vpack.c.bf16 %v1111_v6, %v1109_v5 }
 0x2bc   :  { %2101 = vmatpush1.bf16.msra.mxu1 %v2100_v10  ;;  %v2066_v10 = vpack.c.bf16 %v1052_v8, %v1050_v7 }
 0x2bd   :  { %2103 = vmatprep.subr.bf16.mxu1 %v2102_v11  ;;  %v1049_v11 = vld [vmem:[#allocation8 + $0x1a0] sm:$0xff] }
 0x2be   :  { %v2068_v13 = vpack.c.bf16 %v1051_v12, %v1049_v11  ;;  %2067 = vmatprep.subr.bf16.mxu0 %v2066_v10 }
 0x2c0   :  { %2105 = vmatpush1.bf16.msra.mxu1 %v2104_v16  ;;  %v2130_v16 = vpack.c.bf16 %v1116_v15, %v1114_v14  ;;  %2069 = vmatpush1.bf16.msra.mxu0 %v2068_v13 }
 0x2c1   :  { %2107 = vmatprep.subr.bf16.mxu1 %v2106_v17  ;;  %v1113_v17 = vld [vmem:[#allocation8 + $0x3a0] sm:$0xff] }
 0x2c2   :  { %v2132_v21 = vpack.c.bf16 %v1115_v18, %v1113_v17 }
 0x2c4   :  { %2109 = vmatpush1.bf16.msra.mxu1 %v2108_v22  ;;  %v2070_v22 = vpack.c.bf16 %v1056_v20, %v1054_v19 }
 0x2c5   :  { %2111 = vmatprep.subr.bf16.mxu1 %v2110_v23  ;;  %v1053_v23 = vld [vmem:[#allocation8 + $0x1c0] sm:$0xff] }
 0x2c6   :  { %v2072_v25 = vpack.c.bf16 %v1055_v24, %v1053_v23  ;;  %2071 = vmatprep.subr.bf16.mxu0 %v2070_v22 }
 0x2c8   :  { %2113 = vmatpush1.bf16.msra.mxu1 %v2112_v28  ;;  %v2134_v28 = vpack.c.bf16 %v1120_v27, %v1118_v26  ;;  %2073 = vmatpush1.bf16.msra.mxu0 %v2072_v25 }
 0x2c9   :  { %2115 = vmatprep.subr.bf16.mxu1 %v2114_v29  ;;  %v1058_v29 = vld [vmem:[#allocation8 + $0x1e8] sm:$0xff] }
 0x2cc   :  { %2117 = vmatpush1.bf16.msra.mxu1 %v2116_v36  ;;  %v2074_v36 = vpack.c.bf16 %v1060_v30, %v1058_v29 }
 0x2cd   :  { %2119 = vmatprep.subr.bf16.mxu1 %v2118_v37  ;;  %v1059_v37 = vld [vmem:[#allocation8 + $0x1f0] sm:$0xff] }
 0x2ce   :  { %v2076_v40 = vpack.c.bf16 %v1059_v37, %v1057_v1  ;;  %2075 = vmatprep.subr.bf16.mxu0 %v2074_v36 }
 0x2d0   :  { %2121 = vmatpush1.bf16.msra.mxu1 %v2120_v43  ;;  %v2138_v43 = vpack.c.bf16 %v1124_v42, %v1122_v41  ;;  %2077 = vmatpush1.bf16.msra.mxu0 %v2076_v40 }
 0x2d1   :  { %2123 = vmatprep.subr.bf16.mxu1 %v2122_v52  ;;  %v719_v52 = vlaneseq }
 0x2d3   :  { %v2540_v53 = vshrl.u32 %v719_v52, 7 }
 0x2d4   :  { %2125 = vmatpush1.bf16.msra.mxu1 %v2124_v58 }
 0x2d5   :  { %2127 = vmatprep.subr.bf16.mxu1 %v2126_v4  ;;  %v721_v54 = vsub.s32 0, %v2540_v53  ;;  %v729_v55 = vsub.s32 1, %v2540_v53  ;;  %v753_v56 = vsub.s32 2, %v2540_v53  ;;  %v741_v58 = vsub.s32 4, %v2540_v53 }
 0x2d6   :  { %v761_v59 = vsub.s32 3, %v2540_v53  ;;  %v773_v31 = vsub.s32 5, %v2540_v53 }
 0x2d8   :  { %2129 = vmatpush1.bf16.msra.mxu1 %v2128_v9 }
 0x2d9   :  { %2131 = vmatprep.subr.bf16.mxu1 %v2130_v16 }
 0x2dc   :  { %2133 = vmatpush1.bf16.msra.mxu1 %v2132_v21 }
 0x2dd   :  { %2135 = vmatprep.subr.bf16.mxu1 %v2134_v28 }
 0x2e0   :  { %2137 = vmatpush1.bf16.msra.mxu1 %v2136_v38 }
 0x2e1   :  { %2139 = vmatprep.subr.bf16.mxu1 %v2138_v43 }
 0x2e4   :  { %2141 = vmatpush1.bf16.msra.mxu1 %v2140_v46 }
 0x2e5   :  { %2143 = vmatprep.subr.bf16.mxu1 %v2142_v51 }
 0x37a   :  { %v715_v62 = vpop.f32.mrb[2].mxu1 }
 0x37b   :  { %v722_v63 = vrot.slane %v715_v62, %v721_v54  ;;  %v730_v2 = vrot.slane %v715_v62, %v729_v55  ;;  %v754_v3 = vrot.slane %v715_v62, %v753_v56  ;;  %v1907_v4 = vpop.f32.mrb[3].mxu1  ;;  %v742_v5 = vrot.slane %v715_v62, %v741_v58 }
 0x37c   :  { %v762_v6 = vrot.slane %v715_v62, %v761_v59  ;;  %v774_v7 = vrot.slane %v715_v62, %v773_v31 }
 0x37d   :  { %v723_v8 = vmul.f32 %v722_v63, %v2458_v32  ;;  %v724_v9 = vmul.f32 %v722_v63, %v2464_v35  ;;  %v725_v10 = vmul.f32 %v722_v63, %v2482_v47  ;;  %v726_v11 = vmul.f32 %v722_v63, %v2494_v57 }
 0x37e   :  { %v731_v12 = vmul.f32 %v730_v2, %v2460_v33  ;;  %v732_v13 = vmul.f32 %v730_v2, %v2472_v39  ;;  %v733_v14 = vmul.f32 %v730_v2, %v2487_v50  ;;  %v734_v15 = vmul.f32 %v730_v2, %v2499_v60 }
 0x37f   :  { %v755_v16 = vmul.f32 %v754_v3, %v2458_v32  ;;  %v756_v17 = vmul.f32 %v754_v3, %v2464_v35  ;;  %v757_v18 = vmul.f32 %v754_v3, %v2482_v47  ;;  %v758_v19 = vmul.f32 %v754_v3, %v2494_v57 }
 0x380   :  { %v735_v20 = vadd.f32 %v731_v12, %v723_v8  ;;  %v736_v21 = vadd.f32 %v732_v13, %v724_v9  ;;  %v737_v22 = vadd.f32 %v733_v14, %v725_v10  ;;  %v738_v23 = vadd.f32 %v734_v15, %v726_v11  ;;  %v1127_v8 = vld [vmem:[#allocation8 + $0x410] sm:$0xff]  ;;  %v1130_v9 = vld [vmem:[#allocation8 + $0x428] sm:$0xff]  ;;  %v1132_v13 = vld [vmem:[#allocation8 + $0x438] sm:$0xff] }
 0x381   :  { %v763_v24 = vmul.f32 %v762_v6, %v2460_v33  ;;  %v764_v25 = vmul.f32 %v762_v6, %v2472_v39  ;;  %v765_v26 = vmul.f32 %v762_v6, %v2487_v50  ;;  %v766_v27 = vmul.f32 %v762_v6, %v2499_v60  ;;  %v1125_v6 = vld [vmem:[#allocation8 + $0x400] sm:$0xff] }
 0x382   :  { %v743_v28 = vadd.f32 %v742_v5, %v735_v20  ;;  %v744_v32 = vadd.f32 %v742_v5, %v736_v21  ;;  %v745_v29 = vadd.f32 %v742_v5, %v737_v22  ;;  %v746_v35 = vadd.f32 %v742_v5, %v738_v23  ;;  %v1129_v22 = vld [vmem:[#allocation8 + $0x420] sm:$0xff]  ;;  %v1131_v23 = vld [vmem:[#allocation8 + $0x430] sm:$0xff] }
 0x383   :  { %v767_v30 = vadd.f32 %v763_v24, %v755_v16  ;;  %v768_v47 = vadd.f32 %v764_v25, %v756_v17  ;;  %v769_v34 = vadd.f32 %v765_v26, %v757_v18  ;;  %v770_v57 = vadd.f32 %v766_v27, %v758_v19  ;;  %v1134_v27 = vld [vmem:[#allocation8 + $0x448] sm:$0xff] }
 0x384   :  { %v747_v36 = vmax.f32 %v743_v28, 0.0  ;;  %v748_v61 = vmax.f32 %v744_v32, 0.0  ;;  %v749_v1 = vmax.f32 %v745_v29, 0.0  ;;  %v750_v37 = vmax.f32 %v746_v35, 0.0  ;;  %v1136_v28 = vld [vmem:[#allocation8 + $0x458] sm:$0xff] }
 0x385   :  { %v775_v38 = vadd.f32 %v774_v7, %v767_v30  ;;  %v776_v33 = vadd.f32 %v774_v7, %v768_v47  ;;  %v777_v40 = vadd.f32 %v774_v7, %v769_v34  ;;  %v778_v39 = vadd.f32 %v774_v7, %v770_v57  ;;  %v1133_v34 = vld [vmem:[#allocation8 + $0x440] sm:$0xff]  ;;  %v1135_v57 = vld [vmem:[#allocation8 + $0x450] sm:$0xff] }
 0x386   :  { %v787_v41 = vrot.slane %v747_v36, 7  ;;  %v788_v50 = vrot.slane %v748_v61, 7  ;;  %v790_v42 = vrot.slane %v749_v1, 7  ;;  %v791_v60 = vrot.slane %v750_v37, 7  ;;  %827 = vst [vmem:[#allocation4] sm:$0x1] %v747_v36 }
 0x387   :  { %828 = vst [vmem:[#allocation4 + $0x30] sm:$0x1] %v749_v1  ;;  %v779_v43 = vmax.f32 %v775_v38, 0.0  ;;  %v780_v44 = vmax.f32 %v776_v33, 0.0  ;;  %v781_v45 = vmax.f32 %v777_v40, 0.0  ;;  %v782_v46 = vmax.f32 %v778_v39, 0.0 }
 0x388   :  { %v2577_v48 = vsel %vm431_vm1, %v787_v41, %v788_v50  ;;  %v2580_v49 = vsel %vm431_vm1, %v790_v42, %v791_v60  ;;  %799 = vst [vmem:[#allocation4] sm:$0xfe] %v787_v41  ;;  %801 = vst [vmem:[#allocation4 + $0x20] sm:$0x1] %v788_v50  ;;  %v2144_v19 = vpack.c.bf16 %v1127_v8, %v1125_v6  ;;  %v1138_v33 = vld [vmem:[#allocation8 + $0x468] sm:$0xff]  ;;  %v1140_v40 = vld [vmem:[#allocation8 + $0x478] sm:$0xff] }
 0x389   :  { %802 = vst [vmem:[#allocation4 + $0x30] sm:$0xfe] %v790_v42  ;;  %804 = vst [vmem:[#allocation4 + $0x50] sm:$0x1] %v791_v60  ;;  %v809_v51 = vrot.slane %v779_v43, 7  ;;  %v810_v52 = vrot.slane %v780_v44, 7  ;;  %v2146_v25 = vpack.c.bf16 %v1132_v13, %v1130_v9  ;;  %v2148_v30 = vpack.c.bf16 %v1131_v23, %v1129_v22 }
 0x38a   :  { %831 = vst [vmem:[#allocation4 + $0x21] sm:$0x1] %v788_v50  ;;  %832 = vst [vmem:[#allocation4 + $0x51] sm:$0x1] %v791_v60  ;;  %v812_v62 = vrot.slane %v781_v45, 7  ;;  %v813_v63 = vrot.slane %v782_v46, 7  ;;  %v2150_v37 = vpack.c.bf16 %v1136_v28, %v1134_v27  ;;  %v2152_v60 = vpack.c.bf16 %v1135_v57, %v1133_v34 }
 0x38b   :  { %829 = vst [vmem:[#allocation4 + $0x8] sm:$0x1] %v779_v43  ;;  %830 = vst [vmem:[#allocation4 + $0x38] sm:$0x1] %v781_v45  ;;  %v2583_v2 = vsel %vm431_vm1, %v809_v51, %v810_v52  ;;  %v877_v12 = vrot.slane %v2577_v48, 1  ;;  %v887_v42 = vrot.slane %v2580_v49, 1  ;;  %v2154_v45 = vpack.c.bf16 %v1140_v40, %v1138_v33 }
 0x38c   :  { %v2586_v3 = vsel %vm431_vm1, %v812_v62, %v813_v63  ;;  %821 = vst [vmem:[#allocation4 + $0x8] sm:$0xfe] %v809_v51  ;;  %823 = vst [vmem:[#allocation4 + $0x28] sm:$0x1] %v810_v52  ;;  %v880_v15 = vrot.slane %v2583_v2, 1  ;;  %v1137_v46 = vld [vmem:[#allocation8 + $0x460] sm:$0xff] }
 0x38d   :  { %824 = vst [vmem:[#allocation4 + $0x38] sm:$0xfe] %v812_v62  ;;  %826 = vst [vmem:[#allocation4 + $0x58] sm:$0x1] %v813_v63  ;;  %v890_v1 = vrot.slane %v2586_v3, 1  ;;  %v1139_v51 = vld [vmem:[#allocation8 + $0x470] sm:$0xff] }
 0x38e   :  { %833 = vst [vmem:[#allocation4 + $0x29] sm:$0x1] %v810_v52  ;;  %834 = vst [vmem:[#allocation4 + $0x59] sm:$0x1] %v813_v63  ;;  %v1142_v63 = vld [vmem:[#allocation8 + $0x488] sm:$0xff]  ;;  %v941_v8 = vrot.slane %v2583_v2, 2 }
 0x38f   :  { %v851_v4 = vld [vmem:[#allocation4] sm:$0xfe]  ;;  %v855_v17 = vld [vmem:[#allocation4 + $0x20] sm:$0x1]  ;;  %v1146_v13 = vld [vmem:[#allocation8 + $0x4a8] sm:$0xff] }
 0x390   :  { %v876_v5 = vrot.slane %v851_v4, 1  ;;  %v835_v7 = vld [vmem:[#allocation4] sm:$0xff]  ;;  %v882_v26 = vrot.slane %v855_v17, 1  ;;  %v857_v32 = vld [vmem:[#allocation4 + $0x30] sm:$0xfe]  ;;  %v1144_v4 = vld [vmem:[#allocation8 + $0x498] sm:$0xff] }
 0x391   :  { %v886_v38 = vrot.slane %v857_v32, 1  ;;  %v839_v39 = vld [vmem:[#allocation4 + $0x30] sm:$0xff]  ;;  %v2158_v9 = vpack.c.bf16 %v1144_v4, %v1142_v63  ;;  %v1156_v27 = vld [vmem:[#allocation8 + $0x4f8] sm:$0xff]  ;;  %v1161_v40 = vld [vmem:[#allocation8 + $0x520] sm:$0xff] }
 0x392   :  { %v878_v18 = vsel %vm875_vm11, %v876_v5, %v877_v12  ;;  %v883_v61 = vsel %vm875_vm11, %v877_v12, %v882_v26  ;;  %v861_v41 = vld [vmem:[#allocation4 + $0x50] sm:$0x1]  ;;  %v1154_v26 = vld [vmem:[#allocation8 + $0x4e8] sm:$0xff] }
 0x393   :  { %v836_v10 = vld [vmem:[#allocation4 + $0x8] sm:$0xff]  ;;  %v888_v52 = vsel %vm875_vm11, %v886_v38, %v887_v42  ;;  %v892_v62 = vrot.slane %v861_v41, 1  ;;  %v2170_v32 = vpack.c.bf16 %v1156_v27, %v1154_v26  ;;  %v1171_v63 = vld [vmem:[#allocation8 + $0x570] sm:$0xff]  ;;  %v1185_v27 = vld [vmem:[#allocation8 + $0x5e0] sm:$0xff] }
 0x394   :  { %v852_v11 = vld [vmem:[#allocation4 + $0x8] sm:$0xfe]  ;;  %1253 = vmatprep.mubr.f32.mxu0 %v836_v10  ;;  %v856_v16 = vld [vmem:[#allocation4 + $0x28] sm:$0x1]  ;;  %v858_v24 = vld [vmem:[#allocation4 + $0x38] sm:$0xfe] }
 0x395   :  { %v879_v14 = vrot.slane %v852_v11, 1  ;;  %1254 = vmatmul.mubr.f32.vlgmr.msra.gmra.mrb[8].mxu0 %v835_v7  ;;  %v884_v20 = vrot.slane %v856_v16, 1  ;;  %v840_v29 = vld [vmem:[#allocation4 + $0x38] sm:$0xff]  ;;  %v889_v47 = vrot.slane %v858_v24, 1  ;;  %v913_v44 = vld [vmem:[#allocation4 + $0x8] sm:$0xfc]  ;;  %v2156_v7 = vpack.c.bf16 %v1139_v51, %v1137_v46 }
 0x396   :  { %1259 = vmatprep.mubr.f32.mxu0 %v2583_v2  ;;  %v862_v36 = vld [vmem:[#allocation4 + $0x58] sm:$0x1]  ;;  %v940_v5 = vrot.slane %v913_v44, 2  ;;  %v1141_v10 = vld [vmem:[#allocation8 + $0x480] sm:$0xff]  ;;  %v1143_v11 = vld [vmem:[#allocation8 + $0x490] sm:$0xff]  ;;  %v893_v12 = vsel %vm875_vm11, %v887_v42, %v892_v62 }
 0x397   :  { %v881_v21 = vsel %vm875_vm11, %v879_v14, %v880_v15  ;;  %v885_v35 = vsel %vm875_vm11, %v880_v15, %v884_v20  ;;  %v891_v50 = vsel %vm875_vm11, %v889_v47, %v890_v1  ;;  %v894_v43 = vrot.slane %v862_v36, 1  ;;  %v1148_v14 = vld [vmem:[#allocation8 + $0x4b8] sm:$0xff]  ;;  %v1150_v20 = vld [vmem:[#allocation8 + $0x4c8] sm:$0xff]  ;;  %v1149_v24 = vld [vmem:[#allocation8 + $0x4c0] sm:$0xff] }
 0x398   :  { %1342 = vmatprep.mubr.f32.mxu1 %v881_v21  ;;  %v942_v15 = vsel %vm936_vm12, %v940_v5, %v941_v8  ;;  %v2160_v16 = vpack.c.bf16 %v1143_v11, %v1141_v10  ;;  %v2162_v17 = vpack.c.bf16 %v1148_v14, %v1146_v13  ;;  %v1152_v21 = vld [vmem:[#allocation8 + $0x4d8] sm:$0xff]  ;;  %v1157_v36 = vld [vmem:[#allocation8 + $0x500] sm:$0xff]  ;;  %v1166_v41 = vld [vmem:[#allocation8 + $0x548] sm:$0xff] }
 0x399   :  { %1343 = vmatmul.mubr.f32.vlgmr.msra.gmra.mrb[4].mxu1 %v878_v18  ;;  %1260 = vmatmul.mubr.f32.gmra.mrb[10].mxu0 %v2577_v48  ;;  %v895_v6 = vsel %vm875_vm11, %v890_v1, %v894_v43  ;;  %v1145_v18 = vld [vmem:[#allocation8 + $0x4a0] sm:$0xff]  ;;  %v2166_v23 = vpack.c.bf16 %v1152_v21, %v1150_v20  ;;  %v1160_v47 = vld [vmem:[#allocation8 + $0x518] sm:$0xff]  ;;  %v1162_v1 = vld [vmem:[#allocation8 + $0x528] sm:$0xff] }
 0x39a   :  { %2145 = vmatpush1.bf16.msra.mxu1 %v2144_v19  ;;  %1265 = vmatprep.mubr.f32.mxu0 %v840_v29  ;;  %v1147_v19 = vld [vmem:[#allocation8 + $0x4b0] sm:$0xff]  ;;  %v1153_v29 = vld [vmem:[#allocation8 + $0x4e0] sm:$0xff]  ;;  %v1172_v46 = vld [vmem:[#allocation8 + $0x578] sm:$0xff] }
 0x39b   :  { %1348 = vmatprep.mubr.f32.mxu1 %v885_v35  ;;  %2147 = vmatprep.subr.bf16.mxu1 %v2146_v25  ;;  %v2164_v22 = vpack.c.bf16 %v1147_v19, %v1145_v18  ;;  %v1151_v25 = vld [vmem:[#allocation8 + $0x4d0] sm:$0xff]  ;;  %v1165_v43 = vld [vmem:[#allocation8 + $0x540] sm:$0xff]  ;;  %v1174_v4 = vld [vmem:[#allocation8 + $0x588] sm:$0xff] }
 0x39c   :  { %v2168_v28 = vpack.c.bf16 %v1151_v25, %v1149_v24  ;;  %v1155_v35 = vld [vmem:[#allocation8 + $0x4f0] sm:$0xff]  ;;  %v1169_v62 = vld [vmem:[#allocation8 + $0x560] sm:$0xff]  ;;  %v1176_v5 = vld [vmem:[#allocation8 + $0x598] sm:$0xff] }
 0x39d   :  { %1349 = vmatmul.mubr.f32.gmra.mrb[6].mxu1 %v883_v61  ;;  %1266 = vmatmul.mubr.f32.gmra.mrb[12].mxu0 %v839_v39  ;;  %v2172_v34 = vpack.c.bf16 %v1155_v35, %v1153_v29  ;;  %v1159_v61 = vld [vmem:[#allocation8 + $0x510] sm:$0xff]  ;;  %v1178_v11 = vld [vmem:[#allocation8 + $0x5a8] sm:$0xff]  ;;  %v1184_v18 = vld [vmem:[#allocation8 + $0x5d8] sm:$0xff] }
 0x39e   :  { %2149 = vmatpush1.bf16.msra.mxu1 %v2148_v30  ;;  %1271 = vmatprep.mubr.f32.mxu0 %v2586_v3  ;;  %v1158_v30 = vld [vmem:[#allocation8 + $0x508] sm:$0xff]  ;;  %v2176_v38 = vpack.c.bf16 %v1159_v61, %v1157_v36  ;;  %v1163_v39 = vld [vmem:[#allocation8 + $0x530] sm:$0xff]  ;;  %v1181_v21 = vld [vmem:[#allocation8 + $0x5c0] sm:$0xff] }
 0x39f   :  { %1354 = vmatprep.mubr.f32.mxu1 %v891_v50  ;;  %2151 = vmatprep.subr.bf16.mxu1 %v2150_v37  ;;  %v2174_v57 = vpack.c.bf16 %v1160_v47, %v1158_v30  ;;  %v1164_v37 = vld [vmem:[#allocation8 + $0x538] sm:$0xff]  ;;  %v2180_v42 = vpack.c.bf16 %v1163_v39, %v1161_v40  ;;  %v1167_v44 = vld [vmem:[#allocation8 + $0x550] sm:$0xff]  ;;  %v917_v35 = vld [vmem:[#allocation4 + $0x28] sm:$0x3]  ;;  %v951_v39 = vrot.slane %v2586_v3, 2 }
 0x3a0   :  { %v2178_v33 = vpack.c.bf16 %v1164_v37, %v1162_v1  ;;  %v1168_v50 = vld [vmem:[#allocation8 + $0x558] sm:$0xff]  ;;  %v2184_v51 = vpack.c.bf16 %v1167_v44, %v1165_v43  ;;  %v1175_v10 = vld [vmem:[#allocation8 + $0x590] sm:$0xff]  ;;  %v945_v47 = vrot.slane %v917_v35, 2  ;;  %v948_v43 = vrot.slane %v2580_v49, 2 }
 0x3a1   :  { %1355 = vmatmul.mubr.f32.gmra.mrb[8].mxu1 %v888_v52  ;;  %1272 = vmatmul.mubr.f32.gmra.mrb[14].mxu0 %v2580_v49  ;;  %v1188_v24 = vld [vmem:[#allocation8 + $0x5f8] sm:$0xff] }
 0x3a2   :  { %2153 = vmatpush1.bf16.msra.mxu1 %v2152_v60  ;;  %1360 = vmatprep.mubr.f32.mxu1 %v895_v6  ;;  %v2182_v60 = vpack.c.bf16 %v1168_v50, %v1166_v41  ;;  %v2188_v6 = vpack.c.bf16 %v1171_v63, %v1169_v62  ;;  %v919_v36 = vld [vmem:[#allocation4 + $0x38] sm:$0xfc]  ;;  %v946_v37 = vsel %vm936_vm12, %v941_v8, %v945_v47  ;;  %v923_v40 = vld [vmem:[#allocation4 + $0x58] sm:$0x3] }
 0x3a3   :  { %2155 = vmatprep.subr.bf16.mxu1 %v2154_v45  ;;  %v1170_v45 = vld [vmem:[#allocation8 + $0x568] sm:$0xff] }
 0x3a4   :  { %v2186_v52 = vpack.c.bf16 %v1172_v46, %v1170_v45  ;;  %v2626_v45 = vld [vmem:[%s2763_s8] sm:$0xff] }
 0x3a5   :  { %1361 = vmatmul.mubr.f32.gmra.mrb[10].mxu1 %v893_v12  ;;  %v1180_v12 = vld [vmem:[#allocation8 + $0x5b8] sm:$0xff] }
 0x3a6   :  { %2157 = vmatpush1.bf16.msra.mxu1 %v2156_v7  ;;  %1431 = vmatprep.mubr.f32.mxu1 %v942_v15  ;;  %v2190_v7 = vpack.c.bf16 %v1176_v5, %v1174_v4  ;;  %v2194_v14 = vpack.c.bf16 %v1180_v12, %v1178_v11  ;;  %v1177_v15 = vld [vmem:[#allocation8 + $0x5a0] sm:$0xff] }
 0x3a7   :  { %2159 = vmatprep.subr.bf16.mxu1 %v2158_v9  ;;  %v1173_v9 = vld [vmem:[#allocation8 + $0x580] sm:$0xff] }
 0x3a8   :  { %v2192_v13 = vpack.c.bf16 %v1175_v10, %v1173_v9 }
 0x3aa   :  { %2161 = vmatpush1.bf16.msra.mxu1 %v2160_v16  ;;  %v1179_v16 = vld [vmem:[#allocation8 + $0x5b0] sm:$0xff] }
 0x3ab   :  { %2163 = vmatprep.subr.bf16.mxu1 %v2162_v17  ;;  %v1182_v17 = vld [vmem:[#allocation8 + $0x5c8] sm:$0xff]  ;;  %v2196_v19 = vpack.c.bf16 %v1179_v16, %v1177_v15 }
 0x3ac   :  { %v2198_v20 = vpack.c.bf16 %v1184_v18, %v1182_v17 }
 0x3ae   :  { %2165 = vmatpush1.bf16.msra.mxu1 %v2164_v22  ;;  %v1183_v22 = vld [vmem:[#allocation8 + $0x5d0] sm:$0xff] }
 0x3af   :  { %2167 = vmatprep.subr.bf16.mxu1 %v2166_v23  ;;  %v1186_v23 = vld [vmem:[#allocation8 + $0x5e8] sm:$0xff]  ;;  %v2200_v25 = vpack.c.bf16 %v1183_v22, %v1181_v21 }
 0x3b0   :  { %v2202_v26 = vpack.c.bf16 %v1188_v24, %v1186_v23 }
 0x3b2   :  { %2169 = vmatpush1.bf16.msra.mxu1 %v2168_v28  ;;  %v1187_v28 = vld [vmem:[#allocation8 + $0x5f0] sm:$0xff] }
 0x3b3   :  { %2171 = vmatprep.subr.bf16.mxu1 %v2170_v32  ;;  %v912_v32 = vld [vmem:[#allocation4] sm:$0xfc]  ;;  %v2204_v29 = vpack.c.bf16 %v1187_v28, %v1185_v27 }
 0x3b4   :  { %v937_v30 = vrot.slane %v912_v32, 2 }
 0x3b6   :  { %2173 = vmatpush1.bf16.msra.mxu1 %v2172_v34  ;;  %v916_v34 = vld [vmem:[#allocation4 + $0x20] sm:$0x3] }
 0x3b7   :  { %2175 = vmatprep.subr.bf16.mxu1 %v2174_v57  ;;  %v938_v57 = vrot.slane %v2577_v48, 2  ;;  %v943_v1 = vrot.slane %v916_v34, 2 }
 0x3b9   :  { %v939_v61 = vsel %vm936_vm12, %v937_v30, %v938_v57  ;;  %v944_v41 = vsel %vm936_vm12, %v938_v57, %v943_v1 }
 0x3ba   :  { %2177 = vmatpush1.bf16.msra.mxu1 %v2176_v38  ;;  %v950_v38 = vrot.slane %v919_v36, 2 }
 0x3bb   :  { %2179 = vmatprep.subr.bf16.mxu1 %v2178_v33  ;;  %v918_v33 = vld [vmem:[#allocation4 + $0x30] sm:$0xfc] }
 0x3bc   :  { %v947_v48 = vrot.slane %v918_v33, 2  ;;  %v952_v50 = vsel %vm936_vm12, %v950_v38, %v951_v39 }
 0x3be   :  { %2181 = vmatpush1.bf16.msra.mxu1 %v2180_v42  ;;  %v955_v42 = vrot.slane %v923_v40, 2  ;;  %v949_v2 = vsel %vm936_vm12, %v947_v48, %v948_v43 }
 0x3bf   :  { %2183 = vmatprep.subr.bf16.mxu1 %v2182_v60  ;;  %v922_v60 = vld [vmem:[#allocation4 + $0x50] sm:$0x3] }
 0x3c0   :  { %v953_v8 = vrot.slane %v922_v60, 2  ;;  %v956_v44 = vsel %vm936_vm12, %v951_v39, %v955_v42 }
 0x3c2   :  { %2185 = vmatpush1.bf16.msra.mxu1 %v2184_v51  ;;  %v954_v3 = vsel %vm936_vm12, %v948_v43, %v953_v8 }
 0x3c3   :  { %2187 = vmatprep.subr.bf16.mxu1 %v2186_v52 }
 0x3c6   :  { %2189 = vmatpush1.bf16.msra.mxu1 %v2188_v6 }
 0x3c7   :  { %2191 = vmatprep.subr.bf16.mxu1 %v2190_v7 }
 0x3ca   :  { %2193 = vmatpush1.bf16.msra.mxu1 %v2192_v13 }
 0x3cb   :  { %2195 = vmatprep.subr.bf16.mxu1 %v2194_v14 }
 0x3ce   :  { %2197 = vmatpush1.bf16.msra.mxu1 %v2196_v19 }
 0x3cf   :  { %2199 = vmatprep.subr.bf16.mxu1 %v2198_v20 }
 0x3d2   :  { %2201 = vmatpush1.bf16.msra.mxu1 %v2200_v25 }
 0x3d3   :  { %2203 = vmatprep.subr.bf16.mxu1 %v2202_v26 }
 0x3d6   :  { %2205 = vmatpush1.bf16.msra.mxu1 %v2204_v29 }
 0x3d7   :  { %1908 = vmatprep.subr.mxu1 %v2325_v0 }
 0x3d9   :  { %1432 = vmatmul.mubr.f32.vlgmr.msra.gmra.mrb[4].mxu1 %v939_v61 }
 0x3da   :  { %1437 = vmatprep.mubr.f32.mxu1 %v946_v37 }
 0x3dd   :  { %1438 = vmatmul.mubr.f32.gmra.mrb[6].mxu1 %v944_v41 }
 0x3de   :  { %1443 = vmatprep.mubr.f32.mxu1 %v952_v50 }
 0x3df   :  { %1909 = vmatpush3.xpose.msra.mxu1 %v2626_v45 }
 0x3e0   :  { %1913 = vmatprep.subr.mxu1 %v2325_v0 }
 0x3e1   :  { %1444 = vmatmul.mubr.f32.gmra.mrb[8].mxu1 %v949_v2 }
 0x3e2   :  { %1449 = vmatprep.mubr.f32.mxu1 %v956_v44 }
 0x3e5   :  { %1450 = vmatmul.mubr.f32.gmra.mrb[10].mxu1 %v954_v3 }
 0x3e6   :  { %1910 = vmatprep.mubr.msk.f32.mxu1 %vm2326_vm0, %v2325_v0 }
 0x468   :  { %v1255_v49 = vpop.f32.mrb[8].mxu0 }
 0x469   :  { %v1257_v46 = vpop.f32.mrb[9].mxu0 }
 0x46c   :  { %v1261_v51 = vpop.f32.mrb[10].mxu0 }
 0x46d   :  { %v1263_v52 = vpop.f32.mrb[11].mxu0 }
 0x470   :  { %v1267_v62 = vpop.f32.mrb[12].mxu0 }
 0x471   :  { %v1269_v63 = vpop.f32.mrb[13].mxu0 }
 0x474   :  { %v1273_v4 = vpop.f32.mrb[14].mxu0 }
 0x475   :  { %v1275_v5 = vpop.f32.mrb[15].mxu0 }
 0x4ac   :  { %v1433_v6 = vpop.f32.mrb[4].mxu1 }
 0x4ad   :  { %v2630_v7 = vadd.f32 %v1433_v6, %v1255_v49  ;;  %v1435_v9 = vpop.f32.mrb[5].mxu1 }
 0x4ae   :  { %v2632_v10 = vadd.f32 %v1435_v9, %v1257_v46 }
 0x4af   :  { %v1477_v22 = vmul.f32 %v2630_v7, %v2630_v7 }
 0x4b0   :  { %v1439_v11 = vpop.f32.mrb[6].mxu1  ;;  %v1490_v23 = vmul.f32 %v2632_v10, %v2632_v10  ;;  %v1503_v26 = vmul.f32 %v2632_v10, %v2630_v7 }
 0x4b1   :  { %v2634_v12 = vadd.f32 %v1439_v11, %v1261_v51  ;;  %v1441_v13 = vpop.f32.mrb[7].mxu1 }
 0x4b2   :  { %v2636_v14 = vadd.f32 %v1441_v13, %v1263_v52 }
 0x4b3   :  { %v1478_v16 = vmul.f32 %v2634_v12, %v2634_v12  ;;  %v1459_v24 = vadd.f32 %v2634_v12, %v2630_v7 }
 0x4b4   :  { %v1445_v15 = vpop.f32.mrb[8].mxu1  ;;  %v1491_v17 = vmul.f32 %v2636_v14, %v2636_v14  ;;  %v1504_v20 = vmul.f32 %v2636_v14, %v2634_v12  ;;  %v1468_v27 = vadd.f32 %v2636_v14, %v2632_v10 }
 0x4b5   :  { %v2642_v18 = vadd.f32 %v1445_v15, %v1267_v62  ;;  %v1447_v19 = vpop.f32.mrb[9].mxu1  ;;  %v1481_v35 = vadd.f32 %v1478_v16, %v1477_v22 }
 0x4b6   :  { %v2646_v21 = vadd.f32 %v1447_v19, %v1269_v63  ;;  %v1494_v30 = vadd.f32 %v1491_v17, %v1490_v23  ;;  %v1507_v36 = vadd.f32 %v1504_v20, %v1503_v26 }
 0x4b7   :  { %v1479_v25 = vmul.f32 %v2642_v18, %v2642_v18  ;;  %v1460_v47 = vadd.f32 %v2642_v18, %v1459_v24 }
 0x4b8   :  { %v1492_v28 = vmul.f32 %v2646_v21, %v2646_v21  ;;  %v1505_v32 = vmul.f32 %v2646_v21, %v2642_v18  ;;  %v1451_v29 = vpop.f32.mrb[10].mxu1  ;;  %v1469_v61 = vadd.f32 %v2646_v21, %v1468_v27 }
 0x4b9   :  { %v2665_v34 = vadd.f32 %v1451_v29, %v1273_v4  ;;  %v1453_v57 = vpop.f32.mrb[11].mxu1  ;;  %v1482_v37 = vadd.f32 %v1481_v35, %v1479_v25 }
 0x4ba   :  { %v2668_v1 = vadd.f32 %v1453_v57, %v1275_v5  ;;  %v1495_v38 = vadd.f32 %v1494_v30, %v1492_v28  ;;  %v1508_v39 = vadd.f32 %v1507_v36, %v1505_v32 }
 0x4bb   :  { %v1461_v33 = vadd.f32 %v2665_v34, %v1460_v47  ;;  %v1480_v40 = vmul.f32 %v2665_v34, %v2665_v34 }
 0x4bc   :  { %v1470_v41 = vadd.f32 %v2668_v1, %v1469_v61  ;;  %v1493_v48 = vmul.f32 %v2668_v1, %v2668_v1  ;;  %v1506_v50 = vmul.f32 %v2668_v1, %v2665_v34 }
 0x4bd   :  { %v1462_v42 = vrot.slane %v1461_v33, 4  ;;  %v1483_v60 = vadd.f32 %v1482_v37, %v1480_v40 }
 0x4be   :  { %v1471_v43 = vrot.slane %v1470_v41, 4  ;;  %v1496_v2 = vadd.f32 %v1495_v38, %v1493_v48  ;;  %v1509_v8 = vadd.f32 %v1508_v39, %v1506_v50 }
 0x4bf   :  { %v1463_v44 = vadd.f32 %v1462_v42, %v1461_v33  ;;  %v1484_v3 = vrot.slane %v1483_v60, 4 }
 0x4c0   :  { %v1472_v49 = vadd.f32 %v1471_v43, %v1470_v41  ;;  %v1497_v46 = vrot.slane %v1496_v2, 4  ;;  %v1510_v51 = vrot.slane %v1509_v8, 4 }
 0x4c1   :  { %v1464_v52 = vrot.slane %v1463_v44, 2  ;;  %v1485_v62 = vadd.f32 %v1484_v3, %v1483_v60 }
 0x4c2   :  { %v1473_v63 = vrot.slane %v1472_v49, 2  ;;  %v1498_v4 = vadd.f32 %v1497_v46, %v1496_v2  ;;  %v1511_v5 = vadd.f32 %v1510_v51, %v1509_v8 }
 0x4c3   :  { %v1465_v6 = vadd.f32 %v1464_v52, %v1463_v44  ;;  %v1486_v9 = vrot.slane %v1485_v62, 2 }
 0x4c4   :  { %v1474_v11 = vadd.f32 %v1473_v63, %v1472_v49  ;;  %v1499_v13 = vrot.slane %v1498_v4, 2  ;;  %v1512_v15 = vrot.slane %v1511_v5, 2 }
 0x4c5   :  { %v1466_v16 = vrot.slane %v1465_v6, 1  ;;  %v1487_v17 = vadd.f32 %v1486_v9, %v1485_v62 }
 0x4c6   :  { %v1475_v19 = vrot.slane %v1474_v11, 1  ;;  %v1500_v20 = vadd.f32 %v1499_v13, %v1498_v4  ;;  %v1513_v22 = vadd.f32 %v1512_v15, %v1511_v5 }
 0x4c7   :  { %v1467_v23 = vadd.f32 %v1466_v16, %v1465_v6  ;;  %v1488_v24 = vrot.slane %v1487_v17, 1 }
 0x4c8   :  { %v1476_v25 = vadd.f32 %v1475_v19, %v1474_v11  ;;  %v1501_v26 = vrot.slane %v1500_v20, 1  ;;  %v1514_v27 = vrot.slane %v1513_v22, 1 }
 0x4c9   :  { %v1489_v28 = vadd.f32 %v1488_v24, %v1487_v17  ;;  %v1456_v24 = vld [vmem:[%s2761_s6] sm:$0xf] }
 0x4ca   :  { %v1502_v32 = vadd.f32 %v1501_v26, %v1500_v20  ;;  %v1515_v29 = vadd.f32 %v1514_v27, %v1513_v22  ;;  %v1516_v35 = vsel %vm431_vm1, %v1467_v23, %v1476_v25 }
 0x4cb   :  { %v1517_v30 = vsel %vm433_vm2, %v1516_v35, %v1489_v28 }
 0x4cc   :  { %v1518_v47 = vsel %vm435_vm3, %v1517_v30, %v1502_v32 }
 0x4cd   :  { %v1519_v57 = vsel %vm437_vm4, %v1518_v47, %v1515_v29 }
 0x4ce   :  { %1911 = vmatmul.mubr.f32.vlgmr.msra.gmra.mrb[12].mxu1 %v1519_v57 }
 0x4cf   :  { %1914 = vmatpush3.msra.mxu1 %v2626_v45  ;;  %1915 = vmatprep.mubr.msk.f32.mxu1 %vm2326_vm0, %v2325_v0 }
 0x5a1   :  { %v1586_v36 = vpop.f32.mrb[12].mxu1 }
 0x5a2   :  { %v2685_v61 = vmul.f32 0.001953125, %v1586_v36  ;;  %v1912_v37 = vpop.f32.mrb[13].mxu1 }
 0x5a4   :  { %v1591_v38 = vmul.f32 %v2685_v61, %v2685_v61  ;;  %v1598_v33 = vrot.slane %v2685_v61, 1 }
 0x5a6   :  { %v1593_v40 = vrot.slane %v1591_v38, 6  ;;  %v1600_v39 = vmul.f32 %v1598_v33, %v2685_v61 }
 0x5a8   :  { %v1595_v41 = vsub.f32 %v2685_v61, %v1593_v40  ;;  %v1602_v45 = vrot.slane %v1600_v39, 4 }
 0x5aa   :  { %v1596_v48 = vadd.f32 1e-05, %v1595_v41  ;;  %v1604_v0 = vsub.f32 %v2685_v61, %v1602_v45 }
 0x5ac   :  { %v1606_v50 = vrot.slane %v1596_v48, 1  ;;  %v1609_v42 = vmul.f32 %v1604_v0, %v1604_v0  ;;  %v1643_v17 = vsub.f32 0.0, %v1604_v0 }
 0x5ae   :  { %v1608_v60 = vmul.f32 %v1606_v50, %v1596_v48  ;;  %v1611_v43 = vrot.slane %v1609_v42, 2  ;;  %v1621_v51 = vadd.f32 %v1606_v50, %v1596_v48 }
 0x5b0   :  { %v1613_v2 = vsub.f32 %v1608_v60, %v1611_v43 }
 0x5b2   :  { %2243 = vrsqrt.f32 %v1613_v2  ;;  %vm1616_vm13 = vcmp.eq.f32.partialorder %v1613_v2, inf  ;;  %v1619_v3 = vand.u32 2147483648, %v1613_v2  ;;  %vm1618_vm14 = vcmp.eq.f32.partialorder %v1613_v2, 0.0 }
 0x5bc   :  { %v2244_v8 = vpop.eup %2243 }
 0x5bd   :  { %v1615_v44 = vmul.f32 %v2244_v8, %v1613_v2 }
 0x5bf   :  { %v1617_v49 = vsel %vm1616_vm13, %v1613_v2, %v1615_v44 }
 0x5c0   :  { %v1620_v46 = vsel %vm1618_vm14, %v1619_v3, %v1617_v49  ;;  %v1457_v3 = vld [vmem:[%s2762_s7] sm:$0x3]  ;;  %s2327_s7 = smov [#allocation10]  }
 0x5c1   :  { %v1622_v52 = vmul.f32 2.0, %v1620_v46  ;;  %v1634_v13 = vrot.slane %v1620_v46, 7  ;;  %v1641_v15 = vadd.f32 %v1620_v46, %v1596_v48  ;;  %s1875_s23 = sshll.u32 %s2327_s7, 4  ;;  %s1876_s23 = int_to_ptr.vmem [resolvable:$true] %s1875_s23 }
 0x5c2   :  { %s2293_s24 = scalar_lea.vmem %s1876_s23, 1024  ;;  %p2298_p3 = scmp.lt.s32.totalorder %s1876_s23, %s1876_s23 }
 0x5c3   :  { %v1623_v62 = vadd.f32 %v1622_v52, %v1621_v51  ;;  %v1636_v19 = vadd.f32 %v1634_v13, %v1596_v48  ;;  %v1701_v51 = vrot.slane %v2685_v61, 7  ;;  %p2294_p2 = scmp.ne.s32.totalorder %s1876_s23, %s2293_s24  ;;  %p2299_p4 = scmp.lt.s32.totalorder %s2293_s24, %s2293_s24 }
 0x5c5   :  { %2245 = vrsqrt.f32 %v1623_v62  ;;  %vm1626_vm15 = vcmp.eq.f32.partialorder %v1623_v62, inf  ;;  %v1629_v5 = vand.u32 2147483648, %v1623_v62  ;;  %vm1628_vm0 = vcmp.eq.f32.partialorder %v1623_v62, 0.0  ;;  %p2300_p5 = por %p2299_p4, %p2298_p3 }
 0x5c7   :  { %p2301_p6 = pnand %p2300_p5, %p2294_p2 }
 0x5cf   :  { %v2246_v63 = vpop.eup %2245 }
 0x5d0   :  { %v1625_v4 = vmul.f32 %v2246_v63, %v1623_v62 }
 0x5d2   :  { %v1627_v6 = vsel %vm1626_vm15, %v1623_v62, %v1625_v4 }
 0x5d3   :  { %v1630_v9 = vsel %vm1628_vm0, %v1629_v5, %v1627_v6 }
 0x5d4   :  { %v1631_v11 = vmul.f32 %v1630_v9, %v1620_v46  ;;  %v1694_v46 = vrot.slane %v2685_v61, 6 }
 0x5d6   :  { %2247 = vrcp.f32 %v1631_v11 }
 0x5e0   :  { %v2248_v16 = vpop.eup %2247 }
 0x5e1   :  { %v1638_v20 = vrot.slane %v2248_v16, 7  ;;  %v1642_v22 = vmul.f32 %v2248_v16, %v1641_v15  ;;  %v1644_v23 = vrot.slane %v2248_v16, 6 }
 0x5e3   :  { %v1640_v25 = vmul.f32 %v1638_v20, %v1636_v19  ;;  %v1646_v26 = vmul.f32 %v1644_v23, %v1643_v17  ;;  %v1663_v27 = vrot.slane %v1642_v22, 1  ;;  %v1683_v28 = vrot.slane %v1642_v22, 7 }
 0x5e5   :  { %v1648_v32 = vrot.slane %v1640_v25, 3  ;;  %v1652_v29 = vrot.slane %v1646_v26, 3  ;;  %v1659_v35 = vrot.slane %v1646_v26, 4  ;;  %v1665_v30 = vmul.f32 %v1663_v27, %v1456_v24 }
 0x5e6   :  { %v1670_v47 = vrot.slane %v1640_v25, 1  ;;  %v1673_v57 = vrot.slane %v1646_v26, 1  ;;  %v1680_v36 = vrot.slane %v1646_v26, 2  ;;  %v1685_v37 = vmul.f32 %v1683_v28, %v1456_v24 }
 0x5e7   :  { %v1654_v38 = vmul.f32 %v1652_v29, %v1456_v24  ;;  %v1661_v40 = vmul.f32 %v1659_v35, %v1456_v24  ;;  %v1667_v39 = vrot.slane %v1665_v30, 1  ;;  %v1650_v0 = vmul.f32 %v1648_v32, %v1456_v24 }
 0x5e8   :  { %v1675_v41 = vmul.f32 %v1673_v57, %v1456_v24  ;;  %v1682_v45 = vmul.f32 %v1680_v36, %v1456_v24  ;;  %v1687_v48 = vrot.slane %v1685_v37, 1  ;;  %v1672_v60 = vmul.f32 %v1670_v47, %v1456_v24 }
 0x5e9   :  { %v1656_v50 = vrot.slane %v1654_v38, 1  ;;  %v1669_v42 = vadd.f32 %v1667_v39, %v1661_v40 }
 0x5ea   :  { %v1677_v43 = vrot.slane %v1675_v41, 1  ;;  %v1689_v2 = vadd.f32 %v1687_v48, %v1682_v45 }
 0x5eb   :  { %v1658_v8 = vadd.f32 %v1656_v50, %v1650_v0  ;;  %v1709_v44 = vrot.slane %v1669_v42, 7  ;;  %v1692_v6 = vmul.f32 %v1669_v42, %v1598_v33 }
 0x5ec   :  { %v1679_v49 = vadd.f32 %v1677_v43, %v1672_v60  ;;  %v1703_v63 = vmul.f32 %v1701_v51, %v1689_v2  ;;  %v1712_v17 = vrot.slane %v1689_v2, 7 }
 0x5ed   :  { %v1690_v52 = vmul.f32 %v1658_v8, %v2685_v61  ;;  %v1720_v4 = vsel %vm431_vm1, %v1658_v8, %v1709_v44 }
 0x5ee   :  { %v1696_v62 = vmul.f32 %v1694_v46, %v1679_v49  ;;  %v1721_v13 = vsel %vm433_vm2, %v1720_v4, %v1679_v49  ;;  %v1705_v16 = vrot.slane %v1703_v63, 1 }
 0x5ef   :  { %v1691_v5 = vsub.f32 %v1457_v3, %v1690_v52  ;;  %v1722_v22 = vsel %vm435_vm3, %v1721_v13, %v1712_v17 }
 0x5f0   :  { %v1698_v9 = vrot.slane %v1696_v62, 1 }
 0x5f1   :  { %v1693_v11 = vsub.f32 %v1691_v5, %v1692_v6 }
 0x5f2   :  { %v1700_v15 = vsub.f32 %v1457_v3, %v1698_v9 }
 0x5f3   :  { %v1715_v19 = vrot.slane %v1693_v11, 4 }
 0x5f4   :  { %v1707_v20 = vsub.f32 %v1700_v15, %v1705_v16 }
 0x5f5   :  { %v1723_v23 = vsel %vm437_vm4, %v1722_v22, %v1715_v19 }
 0x5f6   :  { %v1718_v24 = vrot.slane %v1707_v20, 4 }
 0x5f8   :  { %v1724_v25 = vsel %vm643_vm9, %v1723_v23, %v1718_v24 }
 0x5f9   :  { %1916 = vmatmul.mubr.msk.f32.vlgmr.msra.gmra.mrb[14].mxu1 %vm645_vm10, %v1724_v25 }
 0x6cc   :  { %v1794_v61 = vpop.f32.mrb[14].mxu1 }
 0x6cd   :  { %v1801_v33 = vrot.slane %v1794_v61, %v721_v54  ;;  %v1809_v26 = vrot.slane %v1794_v61, %v729_v55  ;;  %v1833_v27 = vrot.slane %v1794_v61, %v753_v56  ;;  %v1917_v28 = vpop.f32.mrb[15].mxu1  ;;  %v1821_v32 = vrot.slane %v1794_v61, %v741_v58 }
 0x6ce   :  { %v1841_v29 = vrot.slane %v1794_v61, %v761_v59  ;;  %v1853_v35 = vrot.slane %v1794_v61, %v773_v31 }
 0x6cf   :  { %v1802_v30 = vmul.f32 %v2630_v7, %v1801_v33  ;;  %v1803_v54 = vmul.f32 %v2634_v12, %v1801_v33  ;;  %v1804_v47 = vmul.f32 %v2642_v18, %v1801_v33  ;;  %v1805_v55 = vmul.f32 %v2665_v34, %v1801_v33 }
 0x6d0   :  { %v1810_v56 = vmul.f32 %v2632_v10, %v1809_v26  ;;  %v1811_v57 = vmul.f32 %v2636_v14, %v1809_v26  ;;  %v1812_v58 = vmul.f32 %v2646_v21, %v1809_v26  ;;  %v1813_v36 = vmul.f32 %v2668_v1, %v1809_v26 }
 0x6d1   :  { %v1834_v59 = vmul.f32 %v2630_v7, %v1833_v27  ;;  %v1835_v53 = vmul.f32 %v2634_v12, %v1833_v27  ;;  %v1836_v31 = vmul.f32 %v2642_v18, %v1833_v27  ;;  %v1837_v37 = vmul.f32 %v2665_v34, %v1833_v27 }
 0x6d2   :  { %v1814_v38 = vadd.f32 %v1810_v56, %v1802_v30  ;;  %v1815_v40 = vadd.f32 %v1811_v57, %v1803_v54  ;;  %v1816_v39 = vadd.f32 %v1812_v58, %v1804_v47  ;;  %v1817_v41 = vadd.f32 %v1813_v36, %v1805_v55 }
 0x6d3   :  { %v1842_v45 = vmul.f32 %v2632_v10, %v1841_v29  ;;  %v1843_v48 = vmul.f32 %v2636_v14, %v1841_v29  ;;  %v1844_v0 = vmul.f32 %v2646_v21, %v1841_v29  ;;  %v1845_v50 = vmul.f32 %v2668_v1, %v1841_v29 }
 0x6d4   :  { %v1822_v42 = vadd.f32 %v1821_v32, %v1814_v38  ;;  %v1823_v7 = vadd.f32 %v1821_v32, %v1815_v40  ;;  %v1824_v60 = vadd.f32 %v1821_v32, %v1816_v39  ;;  %v1825_v12 = vadd.f32 %v1821_v32, %v1817_v41 }
 0x6d5   :  { %v1846_v43 = vadd.f32 %v1842_v45, %v1834_v59  ;;  %v1847_v18 = vadd.f32 %v1843_v48, %v1835_v53  ;;  %v1848_v2 = vadd.f32 %v1844_v0, %v1836_v31  ;;  %v1849_v34 = vadd.f32 %v1845_v50, %v1837_v37 }
 0x6d6   :  { %v1826_v8 = vmax.f32 %v1822_v42, 0.0  ;;  %v1827_v44 = vmax.f32 %v1823_v7, 0.0  ;;  %v1828_v3 = vmax.f32 %v1824_v60, 0.0  ;;  %v1829_v49 = vmax.f32 %v1825_v12, 0.0 }
 0x6d7   :  { %v1854_v10 = vadd.f32 %v1853_v35, %v1846_v43  ;;  %v1855_v14 = vadd.f32 %v1853_v35, %v1847_v18  ;;  %v1856_v46 = vadd.f32 %v1853_v35, %v1848_v2  ;;  %v1857_v21 = vadd.f32 %v1853_v35, %v1849_v34 }
 0x6d8   :  { %1862 = vst [vmem:[#allocation10] sm:$0xff] %v1826_v8  ;;  %1863 = vst [vmem:[#allocation10 + $0x10] sm:$0xff] %v1827_v44 }
 0x6d9   :  { %1864 = vst [vmem:[#allocation10 + $0x20] sm:$0xff] %v1828_v3  ;;  %1865 = vst [vmem:[#allocation10 + $0x30] sm:$0xff] %v1829_v49  ;;  %v1858_v1 = vmax.f32 %v1854_v10, 0.0  ;;  %v1859_v51 = vmax.f32 %v1855_v14, 0.0  ;;  %v1860_v52 = vmax.f32 %v1856_v46, 0.0  ;;  %v1861_v62 = vmax.f32 %v1857_v21, 0.0 }
 0x6db   :  { %1866 = vst [vmem:[#allocation10 + $0x8] sm:$0xff] %v1858_v1  ;;  %1867 = vst [vmem:[#allocation10 + $0x18] sm:$0xff] %v1859_v51 }
 0x6dc   :  { %1868 = vst [vmem:[#allocation10 + $0x28] sm:$0xff] %v1860_v52  ;;  %1869 = vst [vmem:[#allocation10 + $0x38] sm:$0xff] %v1861_v62 }
 0x6dd   :  { %2304 = shalt.err (!%p2301_p6)
}
 0x6de   :  { %s2305_s27 = scalar_lea.hbm %s2764_s9, 1024 }
 0x6df   :  { %p2306_p7 = scmp.ne.s32.totalorder %s2764_s9, %s2305_s27  ;;  %p2309_p8 = scmp.lt.u32.totalorder %s2305_s27, %s2764_s9 }
 0x6e1   :  { %p2311_p9 = pnand %p2309_p8, %p2306_p7 }
 0x6e3   :  { %2314 = shalt.err (!%p2311_p9)
}
 0x6e4   :  { %1881 = dma.vmem_to_hbm [thread:$0]  %s1876_s23, 1024, %s2764_s9, [#allocation7], %s2322_s19, %s2322_s19, %s2323_s20  }
 0x6e5   :  { %2319 = dma.done.wait [#allocation7], 1024  }
 0x6e6   :  { %2320 = vsyncadd [#allocation7], 4294966272 }
 0x6e7   :  { %1885 = vsyncpa [#allocation6], 1 }
 0x6e8   :  { %1886 = vsyncpa [#allocation9], 1 }
 0x6e9   :  { %1887 = vsyncpa [#allocation7], 1 }

</bundles_post_ra>
